<compile_context>
chip_gen: v7x
topology: tpu7x:2x2x1
jax: 0.10.0
libtpu: 0.0.40
codegen_flags: <defaults>
</compile_context>

<pallas_src>
import functools
import math

import jax
import jax.numpy as jnp
from jax.experimental import pallas as pl
from jax.experimental.pallas import tpu as pltpu


# ----------------------------- Pallas kernel ------------------------------ #
def gru_encoder_kernel(x_ref, wi_ref, wh_ref, bcat_ref, bhn_ref,
                       w1_ref, b1_ref, w2_ref, b2_ref, out_ref,
                       *, seq, batch_p, hidden_p, run_backwards):
    """x_ref: (seq*batch_p, input_dim), time-major flattened (NOT flipped)."""
    Hp = hidden_p
    Bp = batch_p
    f32 = jnp.float32

    def sigmoid(v):
        # Single EUP tanh + cheap VPU ops (avoids exp + reciprocal chain).
        return 0.5 * jnp.tanh(0.5 * v) + 0.5

    # Hoisted input projection for ALL time steps: one MXU matmul, with the
    # folded biases (bir+bhr | biz+bhz | bin) added once.
    xg = (jnp.dot(x_ref[...], wi_ref[...], preferred_element_type=f32)
          + bcat_ref[...])                                  # (seq*Bp, 3*Hp)

    wh = wh_ref[...]                                        # (Hp, 3*Hp)
    bhn = jnp.broadcast_to(bhn_ref[...], (Bp, Hp))          # hoisted broadcast

    # run_backwards=True: process original time steps seq-1, ..., 0 (matches
    # flip + forward scan).  Static Python loop -> fully unrolled.
    order = list(range(seq - 1, -1, -1)) if run_backwards else list(range(seq))

    # ---- peeled first step: h0 == 0, so hg == 0 (no MXU matmul needed) ----
    t0 = order[0]
    xg_t = xg[t0 * Bp:(t0 + 1) * Bp, :]                     # whole-tile slice
    r = sigmoid(xg_t[:, :Hp])
    z = sigmoid(xg_t[:, Hp:2 * Hp])
    n = jnp.tanh(xg_t[:, 2 * Hp:] + r * bhn)
    h = n - z * n                                           # == (1 - z) * n

    for t in order[1:]:
        xg_t = xg[t * Bp:(t + 1) * Bp, :]                   # (Bp, 3*Hp) static slice
        # Single fused hidden-state matmul on the serial path.
        hg = jnp.dot(h, wh, preferred_element_type=f32)     # (Bp, 3*Hp)
        r = sigmoid(xg_t[:, :Hp] + hg[:, :Hp])
        z = sigmoid(xg_t[:, Hp:2 * Hp] + hg[:, Hp:2 * Hp])
        n = jnp.tanh(xg_t[:, 2 * Hp:] + r * (hg[:, 2 * Hp:] + bhn))
        h = n + z * (h - n)                                 # == (1-z)*n + z*h

    # rnn_hidden_to_latent MLP on the last GRU output (lane-padded head).
    hid = jnp.maximum(
        jnp.dot(h, w1_ref[...], preferred_element_type=f32) + b1_ref[...], 0.0)
    out_ref[...] = (jnp.dot(hid, w2_ref[...], preferred_element_type=f32)
                    + b2_ref[...]).astype(out_ref.dtype)


# ------------------------------- Wrapper ----------------------------------- #
def gru_encoder_forward(data, params, run_backwards=True):
    """data: (batch, seq, input_dim) float32 -> (batch, output_dim) float32."""
    batch, seq, input_dim = data.shape
    hidden = params["whr"].shape[0]
    H = params["w1"].shape[1]
    out_dim = params["w2"].shape[1]

    Hp = ((hidden + 127) // 128) * 128      # lane-aligned padded GRU hidden
    Bp = ((batch + 7) // 8) * 8             # sublane-aligned padded batch
    HHp = ((H + 127) // 128) * 128          # lane-aligned padded MLP hidden
    Op = ((out_dim + 127) // 128) * 128     # lane-aligned padded output

    # ---- one-time parameter packing (tiny; outside the kernel hot path) ----
    def pad_cols(a, n):
        return jnp.pad(a, ((0, 0), (0, n - a.shape[1])))

    wi_cat = jnp.concatenate([pad_cols(params["wir"], Hp),
                              pad_cols(params["wiz"], Hp),
                              pad_cols(params["win"], Hp)], axis=1)          # (I, 3*Hp)
    wh_cat = jnp.pad(
        jnp.concatenate([pad_cols(params["whr"], Hp),
                         pad_cols(params["whz"], Hp),
                         pad_cols(params["whn"], Hp)], axis=1),
        ((0, Hp - hidden), (0, 0)))                                           # (Hp, 3*Hp)
    b_cat = jnp.concatenate([pad_cols(params["bir"] + params["bhr"], Hp),
                             pad_cols(params["biz"] + params["bhz"], Hp),
                             pad_cols(params["bin"], Hp)], axis=1)            # (1, 3*Hp)
    bhn = pad_cols(params["bhn"], Hp)                                         # (1, Hp)
    w1p = jnp.pad(params["w1"], ((0, Hp - hidden), (0, HHp - H)))             # (Hp, HHp)
    b1p = pad_cols(params["b1"], HHp)                                         # (1, HHp)
    w2p = jnp.pad(params["w2"], ((0, HHp - H), (0, Op - out_dim)))            # (HHp, Op)
    b2p = pad_cols(params["b2"], Op)                                          # (1, Op)

    # Pad batch to a full sublane tile; time-major flatten (NO flip: kernel
    # iterates time in reverse with static indices).
    xp = jnp.pad(data, ((0, Bp - batch), (0, 0), (0, 0)))
    x = jnp.transpose(xp, (1, 0, 2)).reshape(seq * Bp, input_dim)

    kernel = functools.partial(gru_encoder_kernel, seq=seq, batch_p=Bp,
                               hidden_p=Hp, run_backwards=run_backwards)
    vmem = pl.BlockSpec(memory_space=pltpu.MemorySpace.VMEM)

    out_p = pl.pallas_call(
        kernel,
        out_shape=jax.ShapeDtypeStruct((Bp, Op), jnp.float32),
        in_specs=[vmem] * 9,
        out_specs=vmem,
    )(x, wi_cat, wh_cat, b_cat, bhn, w1p, b1p, w2p, b2p)

    return out_p[:batch, :out_dim]


# ------------------------- Parameter construction -------------------------- #
def init_params(key, input_dim, hidden, H, output_dim):
    """Deterministic init mirroring PyTorch default inits (uniform +/- 1/sqrt(fan))."""
    keys = jax.random.split(key, 16)
    kg = 1.0 / math.sqrt(hidden)

    def u(k, shape, bound):
        return jax.random.uniform(k, shape, jnp.float32, -bound, bound)

    p = {}
    # GRU weights, stored transposed (in_features, hidden) for x @ W.
    p["wir"] = u(keys[0], (input_dim, hidden), kg)
    p["wiz"] = u(keys[1], (input_dim, hidden), kg)
    p["win"] = u(keys[2], (input_dim, hidden), kg)
    p["whr"] = u(keys[3], (hidden, hidden), kg)
    p["whz"] = u(keys[4], (hidden, hidden), kg)
    p["whn"] = u(keys[5], (hidden, hidden), kg)
    for i, name in enumerate(("bir", "biz", "bin", "bhr", "bhz", "bhn")):
        p[name] = u(keys[6 + i], (1, hidden), kg)
    # MLP: Linear(hidden, H) -> ReLU -> Linear(H, output_dim)
    k1 = 1.0 / math.sqrt(hidden)
    k2 = 1.0 / math.sqrt(H)
    p["w1"] = u(keys[12], (hidden, H), k1)
    p["b1"] = u(keys[13], (1, H), k1)
    p["w2"] = u(keys[14], (H, output_dim), k2)
    p["b2"] = u(keys[15], (1, output_dim), k2)
    return p


# --------------------------- Pure-JAX reference ----------------------------- #
def gru_encoder_reference(data, params, run_backwards=True):
    x = jnp.transpose(data, (1, 0, 2))
    if run_backwards:
        x = jnp.flip(x, axis=0)
    batch = x.shape[1]
    hidden = params["whr"].shape[0]
    h0 = jnp.zeros((batch, hidden), jnp.float32)

    def step(h, xt):
        r = jax.nn.sigmoid(xt @ params["wir"] + params["bir"]
                           + h @ params["whr"] + params["bhr"])
        z = jax.nn.sigmoid(xt @ params["wiz"] + params["biz"]
                           + h @ params["whz"] + params["bhz"])
        n = jnp.tanh(xt @ params["win"] + params["bin"]
                     + r * (h @ params["whn"] + params["bhn"]))
        return (1.0 - z) * n + z * h, None

    h_last, _ = jax.lax.scan(step, h0, x)
    hid = jnp.maximum(h_last @ params["w1"] + params["b1"], 0.0)
    return hid @ params["w2"] + params["b2"]


# --------------------------------- Main ------------------------------------ #
if __name__ == "__main__":
    batch, seq, input_dim = 2, 8, 16
    rnn_output_size, H, output_dim = 20, 50, 6

    key = jax.random.PRNGKey(0)
    k_data, k_params = jax.random.split(key)
    data = jax.random.normal(k_data, (batch, seq, input_dim), jnp.float32)
    params = init_params(k_params, input_dim, rnn_output_size, H, output_dim)

    out = gru_encoder_forward(data, params, run_backwards=True)
    out = jax.block_until_ready(out)

    ref = jax.block_until_ready(gru_encoder_reference(data, params, True))
    assert out.shape == (batch, output_dim)
    assert jnp.allclose(out, ref, atol=1e-4, rtol=1e-4), (out, ref)

    print("KERNEL_OK")
</pallas_src>

<mosaic_0001>
module attributes {stable_mosaic.version = 11 : i64} {
  func.func @gru_encoder_kernel(%arg0: memref<64x16xf32, #tpu.memory_space<vmem>>, %arg1: memref<16x384xf32, #tpu.memory_space<vmem>>, %arg2: memref<128x384xf32, #tpu.memory_space<vmem>>, %arg3: memref<1x384xf32, #tpu.memory_space<vmem>>, %arg4: memref<1x128xf32, #tpu.memory_space<vmem>>, %arg5: memref<128x128xf32, #tpu.memory_space<vmem>>, %arg6: memref<1x128xf32, #tpu.memory_space<vmem>>, %arg7: memref<128x128xf32, #tpu.memory_space<vmem>>, %arg8: memref<1x128xf32, #tpu.memory_space<vmem>>, %arg9: memref<8x128xf32, #tpu.memory_space<vmem>>) attributes {dimension_semantics = [], scalar_prefetch = 0 : i64, scratch_operands = 0 : i64, tpu.core_type = #tpu.core_type<tc>} {
    %c0 = arith.constant 0 : index
    %c0_0 = arith.constant 0 : index
    %0 = vector.load %arg0[%c0, %c0_0] : memref<64x16xf32, #tpu.memory_space<vmem>>, vector<64x16xf32>
    %c0_1 = arith.constant 0 : index
    %c0_2 = arith.constant 0 : index
    %1 = vector.load %arg1[%c0_1, %c0_2] : memref<16x384xf32, #tpu.memory_space<vmem>>, vector<16x384xf32>
    %cst = arith.constant dense<0.000000e+00> : vector<64x384xf32>
    %2 = tpu.matmul %0, %1, %cst {dimension_numbers = #tpu.dot_dimension_numbers<[1], [0], [0], [1], [0, 0, 1, 1], [], []>} : vector<64x16xf32>, vector<16x384xf32>, vector<64x384xf32> -> vector<64x384xf32>
    %c0_3 = arith.constant 0 : index
    %c0_4 = arith.constant 0 : index
    %3 = vector.load %arg3[%c0_3, %c0_4] : memref<1x384xf32, #tpu.memory_space<vmem>>, vector<1x384xf32>
    %4 = vector.broadcast %3 : vector<1x384xf32> to vector<64x384xf32>
    %5 = arith.addf %2, %4 : vector<64x384xf32>
    %c0_5 = arith.constant 0 : index
    %c0_6 = arith.constant 0 : index
    %6 = vector.load %arg2[%c0_5, %c0_6] : memref<128x384xf32, #tpu.memory_space<vmem>>, vector<128x384xf32>
    %c0_7 = arith.constant 0 : index
    %c0_8 = arith.constant 0 : index
    %7 = vector.load %arg4[%c0_7, %c0_8] : memref<1x128xf32, #tpu.memory_space<vmem>>, vector<1x128xf32>
    %8 = vector.shape_cast %7 : vector<1x128xf32> to vector<1x128xf32>
    %9 = vector.broadcast %8 : vector<1x128xf32> to vector<8x128xf32>
    %10 = vector.extract_strided_slice %5 {offsets = [56, 0], sizes = [8, 384], strides = [1, 1]} : vector<64x384xf32> to vector<8x384xf32>
    %11 = vector.extract_strided_slice %10 {offsets = [0, 0], sizes = [8, 128], strides = [1, 1]} : vector<8x384xf32> to vector<8x128xf32>
    %cst_9 = arith.constant 5.000000e-01 : f32
    %12 = vector.broadcast %cst_9 : f32 to vector<8x128xf32>
    %13 = arith.mulf %12, %11 : vector<8x128xf32>
    %14 = math.tanh %13 : vector<8x128xf32>
    %cst_10 = arith.constant 5.000000e-01 : f32
    %15 = vector.broadcast %cst_10 : f32 to vector<8x128xf32>
    %16 = arith.mulf %15, %14 : vector<8x128xf32>
    %cst_11 = arith.constant 5.000000e-01 : f32
    %17 = vector.broadcast %cst_11 : f32 to vector<8x128xf32>
    %18 = arith.addf %16, %17 : vector<8x128xf32>
    %19 = vector.extract_strided_slice %10 {offsets = [0, 128], sizes = [8, 128], strides = [1, 1]} : vector<8x384xf32> to vector<8x128xf32>
    %cst_12 = arith.constant 5.000000e-01 : f32
    %20 = vector.broadcast %cst_12 : f32 to vector<8x128xf32>
    %21 = arith.mulf %20, %19 : vector<8x128xf32>
    %22 = math.tanh %21 : vector<8x128xf32>
    %cst_13 = arith.constant 5.000000e-01 : f32
    %23 = vector.broadcast %cst_13 : f32 to vector<8x128xf32>
    %24 = arith.mulf %23, %22 : vector<8x128xf32>
    %cst_14 = arith.constant 5.000000e-01 : f32
    %25 = vector.broadcast %cst_14 : f32 to vector<8x128xf32>
    %26 = arith.addf %24, %25 : vector<8x128xf32>
    %27 = vector.extract_strided_slice %10 {offsets = [0, 256], sizes = [8, 128], strides = [1, 1]} : vector<8x384xf32> to vector<8x128xf32>
    %28 = arith.mulf %18, %9 : vector<8x128xf32>
    %29 = arith.addf %27, %28 : vector<8x128xf32>
    %30 = math.tanh %29 : vector<8x128xf32>
    %31 = arith.mulf %26, %30 : vector<8x128xf32>
    %32 = arith.subf %30, %31 : vector<8x128xf32>
    %33 = vector.extract_strided_slice %5 {offsets = [48, 0], sizes = [8, 384], strides = [1, 1]} : vector<64x384xf32> to vector<8x384xf32>
    %cst_15 = arith.constant dense<0.000000e+00> : vector<8x384xf32>
    %34 = tpu.matmul %32, %6, %cst_15 {dimension_numbers = #tpu.dot_dimension_numbers<[1], [0], [0], [1], [0, 0, 1, 1], [], []>} : vector<8x128xf32>, vector<128x384xf32>, vector<8x384xf32> -> vector<8x384xf32>
    %35 = vector.extract_strided_slice %33 {offsets = [0, 0], sizes = [8, 128], strides = [1, 1]} : vector<8x384xf32> to vector<8x128xf32>
    %36 = vector.extract_strided_slice %34 {offsets = [0, 0], sizes = [8, 128], strides = [1, 1]} : vector<8x384xf32> to vector<8x128xf32>
    %37 = arith.addf %35, %36 : vector<8x128xf32>
    %cst_16 = arith.constant 5.000000e-01 : f32
    %38 = vector.broadcast %cst_16 : f32 to vector<8x128xf32>
    %39 = arith.mulf %38, %37 : vector<8x128xf32>
    %40 = math.tanh %39 : vector<8x128xf32>
    %cst_17 = arith.constant 5.000000e-01 : f32
    %41 = vector.broadcast %cst_17 : f32 to vector<8x128xf32>
    %42 = arith.mulf %41, %40 : vector<8x128xf32>
    %cst_18 = arith.constant 5.000000e-01 : f32
    %43 = vector.broadcast %cst_18 : f32 to vector<8x128xf32>
    %44 = arith.addf %42, %43 : vector<8x128xf32>
    %45 = vector.extract_strided_slice %33 {offsets = [0, 128], sizes = [8, 128], strides = [1, 1]} : vector<8x384xf32> to vector<8x128xf32>
    %46 = vector.extract_strided_slice %34 {offsets = [0, 128], sizes = [8, 128], strides = [1, 1]} : vector<8x384xf32> to vector<8x128xf32>
    %47 = arith.addf %45, %46 : vector<8x128xf32>
    %cst_19 = arith.constant 5.000000e-01 : f32
    %48 = vector.broadcast %cst_19 : f32 to vector<8x128xf32>
    %49 = arith.mulf %48, %47 : vector<8x128xf32>
    %50 = math.tanh %49 : vector<8x128xf32>
    %cst_20 = arith.constant 5.000000e-01 : f32
    %51 = vector.broadcast %cst_20 : f32 to vector<8x128xf32>
    %52 = arith.mulf %51, %50 : vector<8x128xf32>
    %cst_21 = arith.constant 5.000000e-01 : f32
    %53 = vector.broadcast %cst_21 : f32 to vector<8x128xf32>
    %54 = arith.addf %52, %53 : vector<8x128xf32>
    %55 = vector.extract_strided_slice %33 {offsets = [0, 256], sizes = [8, 128], strides = [1, 1]} : vector<8x384xf32> to vector<8x128xf32>
    %56 = vector.extract_strided_slice %34 {offsets = [0, 256], sizes = [8, 128], strides = [1, 1]} : vector<8x384xf32> to vector<8x128xf32>
    %57 = arith.addf %56, %9 : vector<8x128xf32>
    %58 = arith.mulf %44, %57 : vector<8x128xf32>
    %59 = arith.addf %55, %58 : vector<8x128xf32>
    %60 = math.tanh %59 : vector<8x128xf32>
    %61 = arith.subf %32, %60 : vector<8x128xf32>
    %62 = arith.mulf %54, %61 : vector<8x128xf32>
    %63 = arith.addf %60, %62 : vector<8x128xf32>
    %64 = vector.extract_strided_slice %5 {offsets = [40, 0], sizes = [8, 384], strides = [1, 1]} : vector<64x384xf32> to vector<8x384xf32>
    %cst_22 = arith.constant dense<0.000000e+00> : vector<8x384xf32>
    %65 = tpu.matmul %63, %6, %cst_22 {dimension_numbers = #tpu.dot_dimension_numbers<[1], [0], [0], [1], [0, 0, 1, 1], [], []>} : vector<8x128xf32>, vector<128x384xf32>, vector<8x384xf32> -> vector<8x384xf32>
    %66 = vector.extract_strided_slice %64 {offsets = [0, 0], sizes = [8, 128], strides = [1, 1]} : vector<8x384xf32> to vector<8x128xf32>
    %67 = vector.extract_strided_slice %65 {offsets = [0, 0], sizes = [8, 128], strides = [1, 1]} : vector<8x384xf32> to vector<8x128xf32>
    %68 = arith.addf %66, %67 : vector<8x128xf32>
    %cst_23 = arith.constant 5.000000e-01 : f32
    %69 = vector.broadcast %cst_23 : f32 to vector<8x128xf32>
    %70 = arith.mulf %69, %68 : vector<8x128xf32>
    %71 = math.tanh %70 : vector<8x128xf32>
    %cst_24 = arith.constant 5.000000e-01 : f32
    %72 = vector.broadcast %cst_24 : f32 to vector<8x128xf32>
    %73 = arith.mulf %72, %71 : vector<8x128xf32>
    %cst_25 = arith.constant 5.000000e-01 : f32
    %74 = vector.broadcast %cst_25 : f32 to vector<8x128xf32>
    %75 = arith.addf %73, %74 : vector<8x128xf32>
    %76 = vector.extract_strided_slice %64 {offsets = [0, 128], sizes = [8, 128], strides = [1, 1]} : vector<8x384xf32> to vector<8x128xf32>
    %77 = vector.extract_strided_slice %65 {offsets = [0, 128], sizes = [8, 128], strides = [1, 1]} : vector<8x384xf32> to vector<8x128xf32>
    %78 = arith.addf %76, %77 : vector<8x128xf32>
    %cst_26 = arith.constant 5.000000e-01 : f32
    %79 = vector.broadcast %cst_26 : f32 to vector<8x128xf32>
    %80 = arith.mulf %79, %78 : vector<8x128xf32>
    %81 = math.tanh %80 : vector<8x128xf32>
    %cst_27 = arith.constant 5.000000e-01 : f32
    %82 = vector.broadcast %cst_27 : f32 to vector<8x128xf32>
    %83 = arith.mulf %82, %81 : vector<8x128xf32>
    %cst_28 = arith.constant 5.000000e-01 : f32
    %84 = vector.broadcast %cst_28 : f32 to vector<8x128xf32>
    %85 = arith.addf %83, %84 : vector<8x128xf32>
    %86 = vector.extract_strided_slice %64 {offsets = [0, 256], sizes = [8, 128], strides = [1, 1]} : vector<8x384xf32> to vector<8x128xf32>
    %87 = vector.extract_strided_slice %65 {offsets = [0, 256], sizes = [8, 128], strides = [1, 1]} : vector<8x384xf32> to vector<8x128xf32>
    %88 = arith.addf %87, %9 : vector<8x128xf32>
    %89 = arith.mulf %75, %88 : vector<8x128xf32>
    %90 = arith.addf %86, %89 : vector<8x128xf32>
    %91 = math.tanh %90 : vector<8x128xf32>
    %92 = arith.subf %63, %91 : vector<8x128xf32>
    %93 = arith.mulf %85, %92 : vector<8x128xf32>
    %94 = arith.addf %91, %93 : vector<8x128xf32>
    %95 = vector.extract_strided_slice %5 {offsets = [32, 0], sizes = [8, 384], strides = [1, 1]} : vector<64x384xf32> to vector<8x384xf32>
    %cst_29 = arith.constant dense<0.000000e+00> : vector<8x384xf32>
    %96 = tpu.matmul %94, %6, %cst_29 {dimension_numbers = #tpu.dot_dimension_numbers<[1], [0], [0], [1], [0, 0, 1, 1], [], []>} : vector<8x128xf32>, vector<128x384xf32>, vector<8x384xf32> -> vector<8x384xf32>
    %97 = vector.extract_strided_slice %95 {offsets = [0, 0], sizes = [8, 128], strides = [1, 1]} : vector<8x384xf32> to vector<8x128xf32>
    %98 = vector.extract_strided_slice %96 {offsets = [0, 0], sizes = [8, 128], strides = [1, 1]} : vector<8x384xf32> to vector<8x128xf32>
    %99 = arith.addf %97, %98 : vector<8x128xf32>
    %cst_30 = arith.constant 5.000000e-01 : f32
    %100 = vector.broadcast %cst_30 : f32 to vector<8x128xf32>
    %101 = arith.mulf %100, %99 : vector<8x128xf32>
    %102 = math.tanh %101 : vector<8x128xf32>
    %cst_31 = arith.constant 5.000000e-01 : f32
    %103 = vector.broadcast %cst_31 : f32 to vector<8x128xf32>
    %104 = arith.mulf %103, %102 : vector<8x128xf32>
    %cst_32 = arith.constant 5.000000e-01 : f32
    %105 = vector.broadcast %cst_32 : f32 to vector<8x128xf32>
    %106 = arith.addf %104, %105 : vector<8x128xf32>
    %107 = vector.extract_strided_slice %95 {offsets = [0, 128], sizes = [8, 128], strides = [1, 1]} : vector<8x384xf32> to vector<8x128xf32>
    %108 = vector.extract_strided_slice %96 {offsets = [0, 128], sizes = [8, 128], strides = [1, 1]} : vector<8x384xf32> to vector<8x128xf32>
    %109 = arith.addf %107, %108 : vector<8x128xf32>
    %cst_33 = arith.constant 5.000000e-01 : f32
    %110 = vector.broadcast %cst_33 : f32 to vector<8x128xf32>
    %111 = arith.mulf %110, %109 : vector<8x128xf32>
    %112 = math.tanh %111 : vector<8x128xf32>
    %cst_34 = arith.constant 5.000000e-01 : f32
    %113 = vector.broadcast %cst_34 : f32 to vector<8x128xf32>
    %114 = arith.mulf %113, %112 : vector<8x128xf32>
    %cst_35 = arith.constant 5.000000e-01 : f32
    %115 = vector.broadcast %cst_35 : f32 to vector<8x128xf32>
    %116 = arith.addf %114, %115 : vector<8x128xf32>
    %117 = vector.extract_strided_slice %95 {offsets = [0, 256], sizes = [8, 128], strides = [1, 1]} : vector<8x384xf32> to vector<8x128xf32>
    %118 = vector.extract_strided_slice %96 {offsets = [0, 256], sizes = [8, 128], strides = [1, 1]} : vector<8x384xf32> to vector<8x128xf32>
    %119 = arith.addf %118, %9 : vector<8x128xf32>
    %120 = arith.mulf %106, %119 : vector<8x128xf32>
    %121 = arith.addf %117, %120 : vector<8x128xf32>
    %122 = math.tanh %121 : vector<8x128xf32>
    %123 = arith.subf %94, %122 : vector<8x128xf32>
    %124 = arith.mulf %116, %123 : vector<8x128xf32>
    %125 = arith.addf %122, %124 : vector<8x128xf32>
    %126 = vector.extract_strided_slice %5 {offsets = [24, 0], sizes = [8, 384], strides = [1, 1]} : vector<64x384xf32> to vector<8x384xf32>
    %cst_36 = arith.constant dense<0.000000e+00> : vector<8x384xf32>
    %127 = tpu.matmul %125, %6, %cst_36 {dimension_numbers = #tpu.dot_dimension_numbers<[1], [0], [0], [1], [0, 0, 1, 1], [], []>} : vector<8x128xf32>, vector<128x384xf32>, vector<8x384xf32> -> vector<8x384xf32>
    %128 = vector.extract_strided_slice %126 {offsets = [0, 0], sizes = [8, 128], strides = [1, 1]} : vector<8x384xf32> to vector<8x128xf32>
    %129 = vector.extract_strided_slice %127 {offsets = [0, 0], sizes = [8, 128], strides = [1, 1]} : vector<8x384xf32> to vector<8x128xf32>
    %130 = arith.addf %128, %129 : vector<8x128xf32>
    %cst_37 = arith.constant 5.000000e-01 : f32
    %131 = vector.broadcast %cst_37 : f32 to vector<8x128xf32>
    %132 = arith.mulf %131, %130 : vector<8x128xf32>
    %133 = math.tanh %132 : vector<8x128xf32>
    %cst_38 = arith.constant 5.000000e-01 : f32
    %134 = vector.broadcast %cst_38 : f32 to vector<8x128xf32>
    %135 = arith.mulf %134, %133 : vector<8x128xf32>
    %cst_39 = arith.constant 5.000000e-01 : f32
    %136 = vector.broadcast %cst_39 : f32 to vector<8x128xf32>
    %137 = arith.addf %135, %136 : vector<8x128xf32>
    %138 = vector.extract_strided_slice %126 {offsets = [0, 128], sizes = [8, 128], strides = [1, 1]} : vector<8x384xf32> to vector<8x128xf32>
    %139 = vector.extract_strided_slice %127 {offsets = [0, 128], sizes = [8, 128], strides = [1, 1]} : vector<8x384xf32> to vector<8x128xf32>
    %140 = arith.addf %138, %139 : vector<8x128xf32>
    %cst_40 = arith.constant 5.000000e-01 : f32
    %141 = vector.broadcast %cst_40 : f32 to vector<8x128xf32>
    %142 = arith.mulf %141, %140 : vector<8x128xf32>
    %143 = math.tanh %142 : vector<8x128xf32>
    %cst_41 = arith.constant 5.000000e-01 : f32
    %144 = vector.broadcast %cst_41 : f32 to vector<8x128xf32>
    %145 = arith.mulf %144, %143 : vector<8x128xf32>
    %cst_42 = arith.constant 5.000000e-01 : f32
    %146 = vector.broadcast %cst_42 : f32 to vector<8x128xf32>
    %147 = arith.addf %145, %146 : vector<8x128xf32>
    %148 = vector.extract_strided_slice %126 {offsets = [0, 256], sizes = [8, 128], strides = [1, 1]} : vector<8x384xf32> to vector<8x128xf32>
    %149 = vector.extract_strided_slice %127 {offsets = [0, 256], sizes = [8, 128], strides = [1, 1]} : vector<8x384xf32> to vector<8x128xf32>
    %150 = arith.addf %149, %9 : vector<8x128xf32>
    %151 = arith.mulf %137, %150 : vector<8x128xf32>
    %152 = arith.addf %148, %151 : vector<8x128xf32>
    %153 = math.tanh %152 : vector<8x128xf32>
    %154 = arith.subf %125, %153 : vector<8x128xf32>
    %155 = arith.mulf %147, %154 : vector<8x128xf32>
    %156 = arith.addf %153, %155 : vector<8x128xf32>
    %157 = vector.extract_strided_slice %5 {offsets = [16, 0], sizes = [8, 384], strides = [1, 1]} : vector<64x384xf32> to vector<8x384xf32>
    %cst_43 = arith.constant dense<0.000000e+00> : vector<8x384xf32>
    %158 = tpu.matmul %156, %6, %cst_43 {dimension_numbers = #tpu.dot_dimension_numbers<[1], [0], [0], [1], [0, 0, 1, 1], [], []>} : vector<8x128xf32>, vector<128x384xf32>, vector<8x384xf32> -> vector<8x384xf32>
    %159 = vector.extract_strided_slice %157 {offsets = [0, 0], sizes = [8, 128], strides = [1, 1]} : vector<8x384xf32> to vector<8x128xf32>
    %160 = vector.extract_strided_slice %158 {offsets = [0, 0], sizes = [8, 128], strides = [1, 1]} : vector<8x384xf32> to vector<8x128xf32>
    %161 = arith.addf %159, %160 : vector<8x128xf32>
    %cst_44 = arith.constant 5.000000e-01 : f32
    %162 = vector.broadcast %cst_44 : f32 to vector<8x128xf32>
    %163 = arith.mulf %162, %161 : vector<8x128xf32>
    %164 = math.tanh %163 : vector<8x128xf32>
    %cst_45 = arith.constant 5.000000e-01 : f32
    %165 = vector.broadcast %cst_45 : f32 to vector<8x128xf32>
    %166 = arith.mulf %165, %164 : vector<8x128xf32>
    %cst_46 = arith.constant 5.000000e-01 : f32
    %167 = vector.broadcast %cst_46 : f32 to vector<8x128xf32>
    %168 = arith.addf %166, %167 : vector<8x128xf32>
    %169 = vector.extract_strided_slice %157 {offsets = [0, 128], sizes = [8, 128], strides = [1, 1]} : vector<8x384xf32> to vector<8x128xf32>
    %170 = vector.extract_strided_slice %158 {offsets = [0, 128], sizes = [8, 128], strides = [1, 1]} : vector<8x384xf32> to vector<8x128xf32>
    %171 = arith.addf %169, %170 : vector<8x128xf32>
    %cst_47 = arith.constant 5.000000e-01 : f32
    %172 = vector.broadcast %cst_47 : f32 to vector<8x128xf32>
    %173 = arith.mulf %172, %171 : vector<8x128xf32>
    %174 = math.tanh %173 : vector<8x128xf32>
    %cst_48 = arith.constant 5.000000e-01 : f32
    %175 = vector.broadcast %cst_48 : f32 to vector<8x128xf32>
    %176 = arith.mulf %175, %174 : vector<8x128xf32>
    %cst_49 = arith.constant 5.000000e-01 : f32
    %177 = vector.broadcast %cst_49 : f32 to vector<8x128xf32>
    %178 = arith.addf %176, %177 : vector<8x128xf32>
    %179 = vector.extract_strided_slice %157 {offsets = [0, 256], sizes = [8, 128], strides = [1, 1]} : vector<8x384xf32> to vector<8x128xf32>
    %180 = vector.extract_strided_slice %158 {offsets = [0, 256], sizes = [8, 128], strides = [1, 1]} : vector<8x384xf32> to vector<8x128xf32>
    %181 = arith.addf %180, %9 : vector<8x128xf32>
    %182 = arith.mulf %168, %181 : vector<8x128xf32>
    %183 = arith.addf %179, %182 : vector<8x128xf32>
    %184 = math.tanh %183 : vector<8x128xf32>
    %185 = arith.subf %156, %184 : vector<8x128xf32>
    %186 = arith.mulf %178, %185 : vector<8x128xf32>
    %187 = arith.addf %184, %186 : vector<8x128xf32>
    %188 = vector.extract_strided_slice %5 {offsets = [8, 0], sizes = [8, 384], strides = [1, 1]} : vector<64x384xf32> to vector<8x384xf32>
    %cst_50 = arith.constant dense<0.000000e+00> : vector<8x384xf32>
    %189 = tpu.matmul %187, %6, %cst_50 {dimension_numbers = #tpu.dot_dimension_numbers<[1], [0], [0], [1], [0, 0, 1, 1], [], []>} : vector<8x128xf32>, vector<128x384xf32>, vector<8x384xf32> -> vector<8x384xf32>
    %190 = vector.extract_strided_slice %188 {offsets = [0, 0], sizes = [8, 128], strides = [1, 1]} : vector<8x384xf32> to vector<8x128xf32>
    %191 = vector.extract_strided_slice %189 {offsets = [0, 0], sizes = [8, 128], strides = [1, 1]} : vector<8x384xf32> to vector<8x128xf32>
    %192 = arith.addf %190, %191 : vector<8x128xf32>
    %cst_51 = arith.constant 5.000000e-01 : f32
    %193 = vector.broadcast %cst_51 : f32 to vector<8x128xf32>
    %194 = arith.mulf %193, %192 : vector<8x128xf32>
    %195 = math.tanh %194 : vector<8x128xf32>
    %cst_52 = arith.constant 5.000000e-01 : f32
    %196 = vector.broadcast %cst_52 : f32 to vector<8x128xf32>
    %197 = arith.mulf %196, %195 : vector<8x128xf32>
    %cst_53 = arith.constant 5.000000e-01 : f32
    %198 = vector.broadcast %cst_53 : f32 to vector<8x128xf32>
    %199 = arith.addf %197, %198 : vector<8x128xf32>
    %200 = vector.extract_strided_slice %188 {offsets = [0, 128], sizes = [8, 128], strides = [1, 1]} : vector<8x384xf32> to vector<8x128xf32>
    %201 = vector.extract_strided_slice %189 {offsets = [0, 128], sizes = [8, 128], strides = [1, 1]} : vector<8x384xf32> to vector<8x128xf32>
    %202 = arith.addf %200, %201 : vector<8x128xf32>
    %cst_54 = arith.constant 5.000000e-01 : f32
    %203 = vector.broadcast %cst_54 : f32 to vector<8x128xf32>
    %204 = arith.mulf %203, %202 : vector<8x128xf32>
    %205 = math.tanh %204 : vector<8x128xf32>
    %cst_55 = arith.constant 5.000000e-01 : f32
    %206 = vector.broadcast %cst_55 : f32 to vector<8x128xf32>
    %207 = arith.mulf %206, %205 : vector<8x128xf32>
    %cst_56 = arith.constant 5.000000e-01 : f32
    %208 = vector.broadcast %cst_56 : f32 to vector<8x128xf32>
    %209 = arith.addf %207, %208 : vector<8x128xf32>
    %210 = vector.extract_strided_slice %188 {offsets = [0, 256], sizes = [8, 128], strides = [1, 1]} : vector<8x384xf32> to vector<8x128xf32>
    %211 = vector.extract_strided_slice %189 {offsets = [0, 256], sizes = [8, 128], strides = [1, 1]} : vector<8x384xf32> to vector<8x128xf32>
    %212 = arith.addf %211, %9 : vector<8x128xf32>
    %213 = arith.mulf %199, %212 : vector<8x128xf32>
    %214 = arith.addf %210, %213 : vector<8x128xf32>
    %215 = math.tanh %214 : vector<8x128xf32>
    %216 = arith.subf %187, %215 : vector<8x128xf32>
    %217 = arith.mulf %209, %216 : vector<8x128xf32>
    %218 = arith.addf %215, %217 : vector<8x128xf32>
    %219 = vector.extract_strided_slice %5 {offsets = [0, 0], sizes = [8, 384], strides = [1, 1]} : vector<64x384xf32> to vector<8x384xf32>
    %cst_57 = arith.constant dense<0.000000e+00> : vector<8x384xf32>
    %220 = tpu.matmul %218, %6, %cst_57 {dimension_numbers = #tpu.dot_dimension_numbers<[1], [0], [0], [1], [0, 0, 1, 1], [], []>} : vector<8x128xf32>, vector<128x384xf32>, vector<8x384xf32> -> vector<8x384xf32>
    %221 = vector.extract_strided_slice %219 {offsets = [0, 0], sizes = [8, 128], strides = [1, 1]} : vector<8x384xf32> to vector<8x128xf32>
    %222 = vector.extract_strided_slice %220 {offsets = [0, 0], sizes = [8, 128], strides = [1, 1]} : vector<8x384xf32> to vector<8x128xf32>
    %223 = arith.addf %221, %222 : vector<8x128xf32>
    %cst_58 = arith.constant 5.000000e-01 : f32
    %224 = vector.broadcast %cst_58 : f32 to vector<8x128xf32>
    %225 = arith.mulf %224, %223 : vector<8x128xf32>
    %226 = math.tanh %225 : vector<8x128xf32>
    %cst_59 = arith.constant 5.000000e-01 : f32
    %227 = vector.broadcast %cst_59 : f32 to vector<8x128xf32>
    %228 = arith.mulf %227, %226 : vector<8x128xf32>
    %cst_60 = arith.constant 5.000000e-01 : f32
    %229 = vector.broadcast %cst_60 : f32 to vector<8x128xf32>
    %230 = arith.addf %228, %229 : vector<8x128xf32>
    %231 = vector.extract_strided_slice %219 {offsets = [0, 128], sizes = [8, 128], strides = [1, 1]} : vector<8x384xf32> to vector<8x128xf32>
    %232 = vector.extract_strided_slice %220 {offsets = [0, 128], sizes = [8, 128], strides = [1, 1]} : vector<8x384xf32> to vector<8x128xf32>
    %233 = arith.addf %231, %232 : vector<8x128xf32>
    %cst_61 = arith.constant 5.000000e-01 : f32
    %234 = vector.broadcast %cst_61 : f32 to vector<8x128xf32>
    %235 = arith.mulf %234, %233 : vector<8x128xf32>
    %236 = math.tanh %235 : vector<8x128xf32>
    %cst_62 = arith.constant 5.000000e-01 : f32
    %237 = vector.broadcast %cst_62 : f32 to vector<8x128xf32>
    %238 = arith.mulf %237, %236 : vector<8x128xf32>
    %cst_63 = arith.constant 5.000000e-01 : f32
    %239 = vector.broadcast %cst_63 : f32 to vector<8x128xf32>
    %240 = arith.addf %238, %239 : vector<8x128xf32>
    %241 = vector.extract_strided_slice %219 {offsets = [0, 256], sizes = [8, 128], strides = [1, 1]} : vector<8x384xf32> to vector<8x128xf32>
    %242 = vector.extract_strided_slice %220 {offsets = [0, 256], sizes = [8, 128], strides = [1, 1]} : vector<8x384xf32> to vector<8x128xf32>
    %243 = arith.addf %242, %9 : vector<8x128xf32>
    %244 = arith.mulf %230, %243 : vector<8x128xf32>
    %245 = arith.addf %241, %244 : vector<8x128xf32>
    %246 = math.tanh %245 : vector<8x128xf32>
    %247 = arith.subf %218, %246 : vector<8x128xf32>
    %248 = arith.mulf %240, %247 : vector<8x128xf32>
    %249 = arith.addf %246, %248 : vector<8x128xf32>
    %c0_64 = arith.constant 0 : index
    %c0_65 = arith.constant 0 : index
    %250 = vector.load %arg5[%c0_64, %c0_65] : memref<128x128xf32, #tpu.memory_space<vmem>>, vector<128x128xf32>
    %cst_66 = arith.constant dense<0.000000e+00> : vector<8x128xf32>
    %251 = tpu.matmul %249, %250, %cst_66 {dimension_numbers = #tpu.dot_dimension_numbers<[1], [0], [0], [1], [0, 0, 1, 1], [], []>} : vector<8x128xf32>, vector<128x128xf32>, vector<8x128xf32> -> vector<8x128xf32>
    %c0_67 = arith.constant 0 : index
    %c0_68 = arith.constant 0 : index
    %252 = vector.load %arg6[%c0_67, %c0_68] : memref<1x128xf32, #tpu.memory_space<vmem>>, vector<1x128xf32>
    %253 = vector.broadcast %252 : vector<1x128xf32> to vector<8x128xf32>
    %254 = arith.addf %251, %253 : vector<8x128xf32>
    %cst_69 = arith.constant 0.000000e+00 : f32
    %255 = vector.broadcast %cst_69 : f32 to vector<8x128xf32>
    %256 = arith.maximumf %254, %255 : vector<8x128xf32>
    %c0_70 = arith.constant 0 : index
    %c0_71 = arith.constant 0 : index
    %257 = vector.load %arg7[%c0_70, %c0_71] : memref<128x128xf32, #tpu.memory_space<vmem>>, vector<128x128xf32>
    %cst_72 = arith.constant dense<0.000000e+00> : vector<8x128xf32>
    %258 = tpu.matmul %256, %257, %cst_72 {dimension_numbers = #tpu.dot_dimension_numbers<[1], [0], [0], [1], [0, 0, 1, 1], [], []>} : vector<8x128xf32>, vector<128x128xf32>, vector<8x128xf32> -> vector<8x128xf32>
    %c0_73 = arith.constant 0 : index
    %c0_74 = arith.constant 0 : index
    %259 = vector.load %arg8[%c0_73, %c0_74] : memref<1x128xf32, #tpu.memory_space<vmem>>, vector<1x128xf32>
    %260 = vector.broadcast %259 : vector<1x128xf32> to vector<8x128xf32>
    %261 = arith.addf %258, %260 : vector<8x128xf32>
    %c0_75 = arith.constant 0 : index
    %c0_76 = arith.constant 0 : index
    %262 = vector.load %arg9[%c0_75, %c0_76] : memref<8x128xf32, #tpu.memory_space<vmem>>, vector<8x128xf32>
    tpu.vector_store %arg9[%c0_75, %c0_76], %261 {strides = array<i32>} : memref<8x128xf32, #tpu.memory_space<vmem>>, vector<8x128xf32>,
    return
  }
}

</mosaic_0001>

<bundles_post_ra>
// kernel: tpu_custom_call.1
= control target key start
LH: loop header
LB: loop body
LE: loop exit
PB: predicated region body
PF: predicated region fallthrough
CT: control target
= control target key end

     0   :  { %14 = vsyncpa [#allocation3], 0  ;;  %s3430_s0 = inlined_call_operand.vmem [shape: f32[64,16], index: 0, kind: input, shape index: {}]   ;;  %s3431_s1 = inlined_call_operand.vmem [shape: f32[16,384], index: 1, kind: input, shape index: {}]   ;;  %s3432_s2 = inlined_call_operand.hbm [shape: f32[128,384], index: 2, kind: input, shape index: {}]   ;;  %s3433_s3 = inlined_call_operand.vmem [shape: f32[1,384], index: 3, kind: input, shape index: {}]   ;;  %s3434_s4 = inlined_call_operand.vmem [shape: f32[1,128], index: 4, kind: input, shape index: {}]   ;;  %s3435_s5 = inlined_call_operand.hbm [shape: f32[128,128], index: 5, kind: input, shape index: {}]   ;;  %s3436_s6 = inlined_call_operand.vmem [shape: f32[1,128], index: 6, kind: input, shape index: {}]   ;;  %s3437_s7 = inlined_call_operand.hbm [shape: f32[128,128], index: 7, kind: input, shape index: {}]   ;;  %s3438_s8 = inlined_call_operand.vmem [shape: f32[1,128], index: 8, kind: input, shape index: {}]   ;;  %s3439_s9 = inlined_call_operand.hbm [shape: f32[8,128], index: 9, kind: output, shape index: {}]  }
   0x1   :  { %15 = vsyncpa [#allocation6], 0 }
   0x2   :  { %16 = vsyncpa [#allocation4], 0  ;;  %s2868_s30 = smov [#allocation5]   ;;  %s2774_s13 = scalar_lea.hbm %s3435_s5, 2048 }
   0x3   :  { %s42_s10 = sshll.u32 %s2868_s30, 4  ;;  %p2775_p0 = scmp.ne.s32.totalorder %s3435_s5, %s2774_s13  ;;  %s43_s10 = int_to_ptr.vmem [resolvable:$true] %s42_s10 }
   0x4   :  { %p2778_p1 = scmp.lt.u32.totalorder %s2774_s13, %s3435_s5 }
   0x6   :  { %p2780_p2 = pnand %p2778_p1, %p2775_p0 }
   0x8   :  { %2783 = shalt.err (!%p2780_p2)
}
   0x9   :  { %s2784_s18 = scalar_lea.vmem %s43_s10, 2048  ;;  %p2789_p4 = scmp.lt.s32.totalorder %s43_s10, %s43_s10 }
   0xa   :  { %p2785_p3 = scmp.ne.s32.totalorder %s43_s10, %s2784_s18  ;;  %p2790_p5 = scmp.lt.s32.totalorder %s2784_s18, %s2784_s18 }
   0xc   :  { %p2791_p6 = por %p2790_p5, %p2789_p4 }
   0xe   :  { %p2792_p7 = pnand %p2791_p6, %p2785_p3 }
  0x10   :  { %2795 = shalt.err (!%p2792_p7)
}
  0x11   :  { %s2869_s19 = smov 128   ;;  %s2870_s20 = smov 8  }
  0x12   :  { %48 = dma.hbm_to_vmem [thread:$0]  %s3435_s5, 2048, %s43_s10, [#allocation6], %s2869_s19, %s2869_s19, %s2870_s20  }
  0x13   :  { %s2871_s23 = smov [#allocation2]   ;;  %s2796_s27 = scalar_lea.hbm %s3432_s2, 6144 }
  0x14   :  { %s26_s24 = sshll.u32 %s2871_s23, 4  ;;  %p2797_p8 = scmp.ne.s32.totalorder %s3432_s2, %s2796_s27  ;;  %s27_s24 = int_to_ptr.vmem [resolvable:$true] %s26_s24 }
  0x15   :  { %p2800_p9 = scmp.lt.u32.totalorder %s2796_s27, %s3432_s2 }
  0x17   :  { %p2802_p10 = pnand %p2800_p9, %p2797_p8 }
  0x19   :  { %2805 = shalt.err (!%p2802_p10)
}
  0x1a   :  { %s2806_s12 = scalar_lea.vmem %s27_s24, 6144  ;;  %p2811_p12 = scmp.lt.s32.totalorder %s27_s24, %s27_s24 }
  0x1b   :  { %p2807_p11 = scmp.ne.s32.totalorder %s27_s24, %s2806_s12  ;;  %p2812_p13 = scmp.lt.s32.totalorder %s2806_s12, %s2806_s12 }
  0x1d   :  { %p2813_p0 = por %p2812_p13, %p2811_p12 }
  0x1f   :  { %p2814_p1 = pnand %p2813_p0, %p2807_p11 }
  0x21   :  { %2817 = shalt.err (!%p2814_p1)
}
  0x22   :  { %s2872_s5 = smov 384   ;;  %s2873_s10 = smov 24  }
  0x23   :  { %32 = dma.hbm_to_vmem [thread:$0]  %s3432_s2, 6144, %s27_s24, [#allocation3], %s2872_s5, %s2872_s5, %s2873_s10  }
  0x24   :  { %s2874_s15 = smov [#allocation7]   ;;  %s2818_s21 = scalar_lea.hbm %s3437_s7, 2048 }
  0x25   :  { %s56_s16 = sshll.u32 %s2874_s15, 4  ;;  %p2819_p2 = scmp.ne.s32.totalorder %s3437_s7, %s2818_s21  ;;  %s57_s16 = int_to_ptr.vmem [resolvable:$true] %s56_s16 }
  0x26   :  { %p2822_p3 = scmp.lt.u32.totalorder %s2818_s21, %s3437_s7 }
  0x28   :  { %p2824_p4 = pnand %p2822_p3, %p2819_p2 }
  0x2a   :  { %2827 = shalt.err (!%p2824_p4)
}
  0x2b   :  { %s2828_s27 = scalar_lea.vmem %s57_s16, 2048  ;;  %p2833_p6 = scmp.lt.s32.totalorder %s57_s16, %s57_s16 }
  0x2c   :  { %p2829_p5 = scmp.ne.s32.totalorder %s57_s16, %s2828_s27  ;;  %p2834_p7 = scmp.lt.s32.totalorder %s2828_s27, %s2828_s27 }
  0x2e   :  { %p2835_p8 = por %p2834_p7, %p2833_p6 }
  0x30   :  { %p2836_p9 = pnand %p2835_p8, %p2829_p5 }
  0x32   :  { %2839 = shalt.err (!%p2836_p9)
}
  0x33   :  { %62 = dma.hbm_to_vmem [thread:$0]  %s3437_s7, 2048, %s57_s16, [#allocation6], %s2869_s19, %s2869_s19, %s2870_s20  }
  0x34   :  { %2862 = dma.done.wait [#allocation3], 6144  }
  0x35   :  { %2863 = vsyncadd [#allocation3], 4294961152 }
  0x36   :  { %2864 = dma.done.wait [#allocation6], 4096  }
  0x37   :  { %2865 = vsyncadd [#allocation6], 4294963200  ;;  %v2875_v0 = vmov 0.0   ;;  %v83_v1 = vld [vmem:[%s3431_s1 + $0x8] sm:$0xff]  ;;  %v86_v2 = vld [vmem:[%s3431_s1 + $0x20] sm:$0xff]  ;;  %vm105_vm0 = vcmask 130048  }
  0x38   :  { %194 = vmatprep.mubr.f32.mxu0 %v2875_v0  ;;  %v82_v3 = vld [vmem:[%s3431_s1] sm:$0xff]  ;;  %v2239_v4 = vpack.c.bf16 %v86_v2, %v83_v1  ;;  %v85_v5 = vld [vmem:[%s3431_s1 + $0x18] sm:$0xff]  ;;  %v84_v8 = vld [vmem:[%s3431_s1 + $0x10] sm:$0xff]  ;;  %v2876_v26 = vmov 0.0|0.0   ;;  %vm2877_vm1 = vmmov 0   ;;  %s2878_s20 = smov [#allocation8]  }
  0x39   :  { %v74_v6 = vld [vmem:[%s3430_s0] sm:$0xff]  ;;  %v2241_v7 = vpack.c.bf16 %v85_v5, %v82_v3  ;;  %v87_v9 = vld [vmem:[%s3431_s1 + $0x28] sm:$0xff]  ;;  %v76_v12 = vld [vmem:[%s3430_s0 + $0x10] sm:$0xff]  ;;  %s1716_s10 = sshll.u32 %s2878_s20, 4  ;;  %s1717_s10 = int_to_ptr.vmem [resolvable:$true] %s1716_s10 }
  0x3a   :  { %1912 = vmatprep.mubr.msk.f32.mxu1 %vm105_vm0, %v74_v6  ;;  %2240 = vmatprep.subr.bf16.mxu0 %v2239_v4  ;;  %v2243_v10 = vpack.c.bf16 %v87_v9, %v84_v8  ;;  %v75_v11 = vld [vmem:[%s3430_s0 + $0x8] sm:$0xff]  ;;  %v77_v13 = vld [vmem:[%s3430_s0 + $0x18] sm:$0xff]  ;;  %v78_v14 = vld [vmem:[%s3430_s0 + $0x20] sm:$0xff]  ;;  %s2840_s13 = scalar_lea.vmem %s1717_s10, 128  ;;  %p2845_p11 = scmp.lt.s32.totalorder %s1717_s10, %s1717_s10 }
  0x3b   :  { %2242 = vmatpush1.bf16.msra.mxu0 %v2241_v7  ;;  %v79_v15 = vld [vmem:[%s3430_s0 + $0x28] sm:$0xff]  ;;  %v80_v16 = vld [vmem:[%s3430_s0 + $0x30] sm:$0xff]  ;;  %v81_v17 = vld [vmem:[%s3430_s0 + $0x38] sm:$0xff]  ;;  %p2841_p10 = scmp.ne.s32.totalorder %s1717_s10, %s2840_s13  ;;  %p2846_p12 = scmp.lt.s32.totalorder %s2840_s13, %s2840_s13 }
  0x3c   :  { %2244 = vmatprep.subr.bf16.mxu1 %v2243_v10  ;;  %v349_v18 = vld [vmem:[#allocation2 + $0x8] sm:$0xff]  ;;  %v352_v19 = vld [vmem:[#allocation2 + $0x20] sm:$0xff]  ;;  %v351_v22 = vld [vmem:[#allocation2 + $0x18] sm:$0xff] }
  0x3d   :  { %2246 = vmatpush3.bf16.msra.mxu1 %v2243_v10  ;;  %v3038_v20 = vpack.c.bf16 %v352_v19, %v349_v18  ;;  %v348_v21 = vld [vmem:[#allocation2] sm:$0xff]  ;;  %v350_v23 = vld [vmem:[#allocation2 + $0x10] sm:$0xff]  ;;  %v353_v25 = vld [vmem:[#allocation2 + $0x28] sm:$0xff]  ;;  %p2847_p13 = por %p2846_p12, %p2845_p11 }
  0x3e   :  { %1726 = vmatmul.mubr.msk.f32.vlgmr.msra.gmra.mrb[0].mxu0 %vm105_vm0, %v74_v6  ;;  %v3040_v24 = vpack.c.bf16 %v351_v22, %v348_v21  ;;  %2279 = vmatprep.subr.bf16.mxu1 %v2876_v26  ;;  %v3044_v27 = vpack.c.bf16 %v353_v25, %v350_v23  ;;  %v355_v28 = vld [vmem:[#allocation2 + $0x38] sm:$0xff]  ;;  %v358_v29 = vld [vmem:[#allocation2 + $0x50] sm:$0xff]  ;;  %v357_v32 = vld [vmem:[#allocation2 + $0x48] sm:$0xff] }
  0x3f   :  { %200 = vmatprep.mubr.f32.mxu0 %v2875_v0  ;;  %2248 = vmatprep.subr.bf16.mxu0 %v3038_v20  ;;  %v3048_v30 = vpack.c.bf16 %v358_v29, %v355_v28  ;;  %v354_v31 = vld [vmem:[#allocation2 + $0x30] sm:$0xff]  ;;  %v356_v33 = vld [vmem:[#allocation2 + $0x40] sm:$0xff]  ;;  %v359_v35 = vld [vmem:[#allocation2 + $0x58] sm:$0xff]  ;;  %p2848_p0 = pnand %p2847_p13, %p2841_p10 }
  0x40   :  { %1913 = vmatmul.mubr.msk.f32.vlgmr.msra.gmra.mrb[0].mxu1 %vm105_vm0, %v75_v11  ;;  %2250 = vmatpush1.bf16.msra.mxu0 %v3040_v24  ;;  %v3050_v34 = vpack.c.bf16 %v357_v32, %v354_v31  ;;  %v3054_v36 = vpack.c.bf16 %v359_v35, %v356_v33  ;;  %v361_v37 = vld [vmem:[#allocation2 + $0x68] sm:$0xff]  ;;  %v364_v38 = vld [vmem:[#allocation2 + $0x80] sm:$0xff]  ;;  %v363_v41 = vld [vmem:[#allocation2 + $0x78] sm:$0xff]  ;;  %v90_v33 = vlaneseq }
  0x41   :  { %1915 = vmatprep.mubr.msk.f32.mxu1 %vm105_vm0, %v76_v12  ;;  %2281 = vmatpush3.bf16.msra.mxu1 %v3044_v27  ;;  %v3058_v39 = vpack.c.bf16 %v364_v38, %v361_v37  ;;  %v360_v40 = vld [vmem:[#allocation2 + $0x60] sm:$0xff]  ;;  %v362_v42 = vld [vmem:[#allocation2 + $0x70] sm:$0xff]  ;;  %v365_v44 = vld [vmem:[#allocation2 + $0x88] sm:$0xff] }
  0x42   :  { %1727 = vmatmul.mubr.msk.f32.gmra.mrb[2].mxu0 %vm105_vm0, %v75_v11  ;;  %2282 = vmatprep.subr.bf16.mxu1 %v2876_v26  ;;  %v3060_v43 = vpack.c.bf16 %v363_v41, %v360_v40  ;;  %v3064_v45 = vpack.c.bf16 %v365_v44, %v362_v42  ;;  %v367_v46 = vld [vmem:[#allocation2 + $0x98] sm:$0xff]  ;;  %v370_v47 = vld [vmem:[#allocation2 + $0xb0] sm:$0xff]  ;;  %v369_v50 = vld [vmem:[#allocation2 + $0xa8] sm:$0xff]  ;;  %v91_v35 = vshrl.u32 %v90_v33, 7 }
  0x43   :  { %206 = vmatprep.mubr.f32.mxu0 %v2875_v0  ;;  %2252 = vmatprep.subr.bf16.mxu0 %v3048_v30  ;;  %v3068_v48 = vpack.c.bf16 %v370_v47, %v367_v46  ;;  %v366_v49 = vld [vmem:[#allocation2 + $0x90] sm:$0xff]  ;;  %v368_v51 = vld [vmem:[#allocation2 + $0xa0] sm:$0xff]  ;;  %v371_v53 = vld [vmem:[#allocation2 + $0xb8] sm:$0xff] }
  0x44   :  { %1916 = vmatmul.mubr.msk.f32.gmra.mrb[2].mxu1 %vm105_vm0, %v77_v13  ;;  %2254 = vmatpush1.bf16.msra.mxu0 %v3050_v34  ;;  %v3070_v52 = vpack.c.bf16 %v369_v50, %v366_v49  ;;  %v3074_v54 = vpack.c.bf16 %v371_v53, %v368_v51  ;;  %v373_v55 = vld [vmem:[#allocation2 + $0xc8] sm:$0xff]  ;;  %v376_v56 = vld [vmem:[#allocation2 + $0xe0] sm:$0xff]  ;;  %v375_v59 = vld [vmem:[#allocation2 + $0xd8] sm:$0xff]  ;;  %v100_v37 = vsub.s32 2, %v91_v35 }
  0x45   :  { %1918 = vmatprep.mubr.msk.f32.mxu1 %vm105_vm0, %v78_v14  ;;  %2284 = vmatpush3.bf16.msra.mxu1 %v3054_v36  ;;  %v3078_v57 = vpack.c.bf16 %v376_v56, %v373_v55  ;;  %v372_v58 = vld [vmem:[#allocation2 + $0xc0] sm:$0xff]  ;;  %v374_v60 = vld [vmem:[#allocation2 + $0xd0] sm:$0xff]  ;;  %v377_v62 = vld [vmem:[#allocation2 + $0xe8] sm:$0xff] }
  0x46   :  { %1728 = vmatmul.mubr.msk.f32.gmra.mrb[4].mxu0 %vm105_vm0, %v76_v12  ;;  %2285 = vmatprep.subr.bf16.mxu1 %v2876_v26  ;;  %v3080_v61 = vpack.c.bf16 %v375_v59, %v372_v58  ;;  %v3084_v63 = vpack.c.bf16 %v377_v62, %v374_v60  ;;  %v379_v1 = vld [vmem:[#allocation2 + $0xf8] sm:$0xff]  ;;  %v382_v2 = vld [vmem:[#allocation2 + $0x110] sm:$0xff]  ;;  %v381_v5 = vld [vmem:[#allocation2 + $0x108] sm:$0xff] }
  0x47   :  { %212 = vmatprep.mubr.f32.mxu0 %v2875_v0  ;;  %2256 = vmatprep.subr.bf16.mxu0 %v3058_v39  ;;  %v378_v3 = vld [vmem:[#allocation2 + $0xf0] sm:$0xff]  ;;  %v3088_v4 = vpack.c.bf16 %v382_v2, %v379_v1  ;;  %v380_v6 = vld [vmem:[#allocation2 + $0x100] sm:$0xff]  ;;  %v383_v7 = vld [vmem:[#allocation2 + $0x118] sm:$0xff]  ;;  %v92_v1 = vsub.s32 0, %v91_v35 }
  0x48   :  { %1919 = vmatmul.mubr.msk.f32.gmra.mrb[4].mxu1 %vm105_vm0, %v79_v15  ;;  %2258 = vmatpush1.bf16.msra.mxu0 %v3060_v43  ;;  %v3092_v8 = vpack.c.bf16 %v381_v5, %v378_v3  ;;  %v3095_v9 = vpack.c.bf16 %v383_v7, %v380_v6  ;;  %v385_v10 = vld [vmem:[#allocation2 + $0x128] sm:$0xff]  ;;  %v388_v11 = vld [vmem:[#allocation2 + $0x140] sm:$0xff]  ;;  %v391_v18 = vld [vmem:[#allocation2 + $0x158] sm:$0xff]  ;;  %v96_v5 = vsub.s32 1, %v91_v35 }
  0x49   :  { %1921 = vmatprep.mubr.msk.f32.mxu1 %vm105_vm0, %v80_v16  ;;  %2287 = vmatpush3.bf16.msra.mxu1 %v3064_v45  ;;  %v384_v12 = vld [vmem:[#allocation2 + $0x120] sm:$0xff]  ;;  %v394_v19 = vld [vmem:[#allocation2 + $0x170] sm:$0xff]  ;;  %v393_v25 = vld [vmem:[#allocation2 + $0x168] sm:$0xff] }
  0x4a   :  { %1729 = vmatmul.mubr.msk.f32.gmra.mrb[6].mxu0 %vm105_vm0, %v77_v13  ;;  %2288 = vmatprep.subr.bf16.mxu1 %v2876_v26  ;;  %v3098_v13 = vpack.c.bf16 %v388_v11, %v385_v10  ;;  %v3107_v22 = vpack.c.bf16 %v394_v19, %v391_v18  ;;  %v390_v23 = vld [vmem:[#allocation2 + $0x150] sm:$0xff]  ;;  %v392_v28 = vld [vmem:[#allocation2 + $0x160] sm:$0xff]  ;;  %v395_v29 = vld [vmem:[#allocation2 + $0x178] sm:$0xff] }
  0x4b   :  { %218 = vmatprep.mubr.f32.mxu0 %v2875_v0  ;;  %2260 = vmatprep.subr.bf16.mxu0 %v3068_v48  ;;  %v3111_v31 = vpack.c.bf16 %v393_v25, %v390_v23  ;;  %v3115_v32 = vpack.c.bf16 %v395_v29, %v392_v28  ;;  %v88_v38 = vld [vmem:[%s3433_s3] sm:$0x7] }
  0x4c   :  { %1922 = vmatmul.mubr.msk.f32.gmra.mrb[6].mxu1 %vm105_vm0, %v81_v17  ;;  %2262 = vmatpush1.bf16.msra.mxu0 %v3070_v52  ;;  %v101_v40 = vrot.slane %v88_v38, %v100_v37  ;;  %v3139_v2 = vrot.slane %v88_v38, %v92_v1  ;;  %v3142_v11 = vrot.slane %v88_v38, %v96_v5  ;;  %v3148_v18 = vld [vmem:[%s3434_s4] ss:$0 sm:$0xff] }
  0x4d   :  { %2290 = vmatpush3.bf16.msra.mxu1 %v3074_v54  ;;  %2264 = vmatprep.subr.bf16.mxu0 %v3078_v57 }
  0x4e   :  { %1730 = vmatmul.mubr.msk.f32.gmra.mrb[8].mxu0 %vm105_vm0, %v78_v14  ;;  %2291 = vmatprep.subr.bf16.mxu1 %v2876_v26  ;;  %v387_v14 = vld [vmem:[#allocation2 + $0x138] sm:$0xff] }
  0x4f   :  { %224 = vmatprep.mubr.f32.mxu0 %v2875_v0  ;;  %1956 = vmatprep.mubr.msk.f32.mxu1 %vm2877_vm1, %v2875_v0 }
  0x50   :  { %2266 = vmatpush1.bf16.msra.mxu0 %v3080_v61 }
  0x51   :  { %2293 = vmatpush3.bf16.msra.mxu1 %v3084_v63  ;;  %2268 = vmatprep.subr.bf16.mxu0 %v3088_v4 }
  0x52   :  { %1731 = vmatmul.mubr.msk.f32.gmra.mrb[10].mxu0 %vm105_vm0, %v79_v15  ;;  %2294 = vmatprep.subr.bf16.mxu1 %v2876_v26  ;;  %v386_v15 = vld [vmem:[#allocation2 + $0x130] sm:$0xff] }
  0x53   :  { %230 = vmatprep.mubr.f32.mxu0 %v2875_v0 }
  0x54   :  { %2270 = vmatpush1.bf16.msra.mxu0 %v3092_v8 }
  0x55   :  { %2296 = vmatpush3.bf16.msra.mxu1 %v3095_v9  ;;  %2272 = vmatprep.subr.bf16.mxu0 %v3098_v13 }
  0x56   :  { %1732 = vmatmul.mubr.msk.f32.gmra.mrb[12].mxu0 %vm105_vm0, %v80_v16  ;;  %v389_v16 = vld [vmem:[#allocation2 + $0x148] sm:$0xff]  ;;  %2297 = vmatprep.subr.bf16.mxu1 %v2876_v26 }
  0x57   :  { %236 = vmatprep.mubr.f32.mxu0 %v2875_v0  ;;  %v3105_v21 = vpack.c.bf16 %v389_v16, %v386_v15 }
  0x59   :  { %2299 = vmatpush3.bf16.msra.mxu1 %v3105_v21 }
  0x5a   :  { %1733 = vmatmul.mubr.msk.f32.gmra.mrb[14].mxu0 %vm105_vm0, %v81_v17  ;;  %v3101_v17 = vpack.c.bf16 %v387_v14, %v384_v12  ;;  %2300 = vmatprep.subr.bf16.mxu1 %v2876_v26 }
  0x5b   :  { %480 = vmatprep.mubr.f32.mxu0 %v2875_v0 }
  0x5c   :  { %2274 = vmatpush1.bf16.msra.mxu0 %v3101_v17 }
  0x5d   :  { %2276 = vmatprep.subr.bf16.mxu0 %v3107_v22  ;;  %2302 = vmatpush3.bf16.msra.mxu1 %v3115_v32 }
  0x5e   :  { %2335 = vmatprep.subr.bf16.mxu1 %v2876_v26 }
  0x60   :  { %2278 = vmatpush1.bf16.msra.mxu0 %v3111_v31 }
  0x61   :  { %2304 = vmatprep.subr.bf16.mxu0 %v3038_v20 }
 0x113   :  { %v1914_v41 = vpop.f32.mrb[0].mxu1 }
 0x114   :  { %v3125_v42 = vadd.f32 %v1914_v41, %v101_v40  ;;  %v309_v44 = vpop.f32.mrb[1].mxu1 }
 0x115   :  { %v3127_v46 = vadd.f32 %v309_v44, %v101_v40 }
 0x117   :  { %v1917_v47 = vpop.f32.mrb[2].mxu1 }
 0x118   :  { %v3129_v49 = vadd.f32 %v1917_v47, %v101_v40  ;;  %v319_v50 = vpop.f32.mrb[3].mxu1 }
 0x119   :  { %v3131_v51 = vadd.f32 %v319_v50, %v101_v40 }
 0x11b   :  { %v1920_v53 = vpop.f32.mrb[4].mxu1 }
 0x11c   :  { %v3133_v55 = vadd.f32 %v1920_v53, %v101_v40  ;;  %v329_v56 = vpop.f32.mrb[5].mxu1 }
 0x11d   :  { %v3135_v58 = vadd.f32 %v329_v56, %v101_v40 }
 0x11f   :  { %v1923_v59 = vpop.f32.mrb[6].mxu1 }
 0x120   :  { %v339_v60 = vpop.f32.mrb[7].mxu1  ;;  %v345_v23 = vadd.f32 %v1923_v59, %v101_v40 }
 0x121   :  { %v3137_v62 = vadd.f32 %v339_v60, %v101_v40 }
 0x12d   :  { %v238_v3 = vpop.f32.mrb[14].mxu0 }
 0x12e   :  { %v239_v6 = vadd.f32 %v238_v3, %v3139_v2  ;;  %v240_v7 = vpop.f32.mrb[15].mxu0 }
 0x12f   :  { %v241_v12 = vadd.f32 %v240_v7, %v3142_v11 }
 0x130   :  { %v403_v10 = vmul.f32 0.5, %v239_v6 }
 0x131   :  { %v407_v14 = vmul.f32 0.5, %v241_v12 }
 0x132   :  { %2726 = vtanh.f32 %v403_v10 }
 0x133   :  { %2728 = vtanh.f32 %v407_v14 }
 0x13c   :  { %v2727_v15 = vpop.eup %2726 }
 0x13d   :  { %v405_v16 = vmul.f32 0.5, %v2727_v15  ;;  %v2729_v29 = vpop.eup %2728 }
 0x13e   :  { %v409_v33 = vmul.f32 0.5, %v2729_v29 }
 0x13f   :  { %v406_v19 = vadd.f32 0.5, %v405_v16 }
 0x140   :  { %v410_v35 = vadd.f32 0.5, %v409_v33 }
 0x141   :  { %v411_v25 = vmul.f32 %v3148_v18, %v406_v19 }
 0x143   :  { %v412_v28 = vadd.f32 %v411_v25, %v345_v23 }
 0x145   :  { %2730 = vtanh.f32 %v412_v28 }
 0x14f   :  { %v2731_v37 = vpop.eup %2730 }
 0x150   :  { %v414_v38 = vmul.f32 %v2731_v37, %v410_v35 }
 0x152   :  { %v415_v41 = vsub.f32 %v2731_v37, %v414_v38 }
 0x154   :  { %481 = vmatmul.mubr.f32.vlgmr.msra.gmra.mrb[12].mxu0 %v415_v41  ;;  %1957 = vmatmul.mubr.f32.vlgmr.msra.gmra.mrb[8].mxu1 %v415_v41 }
 0x155   :  { %2306 = vmatpush1.bf16.msra.mxu0 %v3040_v24  ;;  %2337 = vmatpush3.bf16.msra.mxu1 %v3044_v27 }
 0x156   :  { %2308 = vmatprep.subr.bf16.mxu0 %v3048_v30  ;;  %2338 = vmatprep.subr.bf16.mxu1 %v2876_v26 }
 0x157   :  { %638 = vmatprep.mubr.f32.mxu0 %v2875_v0  ;;  %1991 = vmatprep.mubr.msk.f32.mxu1 %vm2877_vm1, %v2875_v0 }
 0x159   :  { %2310 = vmatpush1.bf16.msra.mxu0 %v3050_v34  ;;  %2340 = vmatpush3.bf16.msra.mxu1 %v3054_v36 }
 0x15a   :  { %2312 = vmatprep.subr.bf16.mxu0 %v3058_v39  ;;  %2341 = vmatprep.subr.bf16.mxu1 %v2876_v26 }
 0x15d   :  { %2314 = vmatpush1.bf16.msra.mxu0 %v3060_v43  ;;  %2343 = vmatpush3.bf16.msra.mxu1 %v3064_v45 }
 0x15e   :  { %2316 = vmatprep.subr.bf16.mxu0 %v3068_v48  ;;  %2344 = vmatprep.subr.bf16.mxu1 %v2876_v26 }
 0x161   :  { %2318 = vmatpush1.bf16.msra.mxu0 %v3070_v52  ;;  %2346 = vmatpush3.bf16.msra.mxu1 %v3074_v54 }
 0x162   :  { %2320 = vmatprep.subr.bf16.mxu0 %v3078_v57  ;;  %2347 = vmatprep.subr.bf16.mxu1 %v2876_v26 }
 0x165   :  { %2322 = vmatpush1.bf16.msra.mxu0 %v3080_v61  ;;  %2349 = vmatpush3.bf16.msra.mxu1 %v3084_v63 }
 0x166   :  { %2324 = vmatprep.subr.bf16.mxu0 %v3088_v4  ;;  %2350 = vmatprep.subr.bf16.mxu1 %v2876_v26 }
 0x169   :  { %2326 = vmatpush1.bf16.msra.mxu0 %v3092_v8  ;;  %2352 = vmatpush3.bf16.msra.mxu1 %v3095_v9 }
 0x16a   :  { %2328 = vmatprep.subr.bf16.mxu0 %v3098_v13  ;;  %2353 = vmatprep.subr.bf16.mxu1 %v2876_v26 }
 0x16d   :  { %2330 = vmatpush1.bf16.msra.mxu0 %v3101_v17  ;;  %2355 = vmatpush3.bf16.msra.mxu1 %v3105_v21 }
 0x16e   :  { %2332 = vmatprep.subr.bf16.mxu0 %v3107_v22  ;;  %2356 = vmatprep.subr.bf16.mxu1 %v2876_v26 }
 0x171   :  { %2334 = vmatpush1.bf16.msra.mxu0 %v3111_v31  ;;  %2358 = vmatpush3.bf16.msra.mxu1 %v3115_v32 }
 0x172   :  { %2360 = vmatprep.subr.bf16.mxu0 %v3038_v20  ;;  %2391 = vmatprep.subr.bf16.mxu1 %v2876_v26 }
 0x227   :  { %v482_v40 = vpop.f32.mrb[12].mxu0  ;;  %v553_v44 = vpop.f32.mrb[8].mxu1 }
 0x228   :  { %v2699_v47 = vadd.f32 %v482_v40, %v3139_v2  ;;  %v484_v50 = vpop.f32.mrb[13].mxu0  ;;  %v1958_v53 = vpop.f32.mrb[9].mxu1  ;;  %v567_v6 = vadd.f32 %v3148_v18, %v553_v44 }
 0x229   :  { %v2700_v59 = vadd.f32 %v484_v50, %v3142_v11 }
 0x22a   :  { %v558_v56 = vmul.f32 0.5, %v2699_v47 }
 0x22b   :  { %v563_v60 = vmul.f32 0.5, %v2700_v59 }
 0x22c   :  { %2732 = vtanh.f32 %v558_v56 }
 0x22d   :  { %2734 = vtanh.f32 %v563_v60 }
 0x236   :  { %v2733_v1 = vpop.eup %2732 }
 0x237   :  { %v560_v3 = vmul.f32 0.5, %v2733_v1  ;;  %v2735_v12 = vpop.eup %2734 }
 0x238   :  { %v565_v14 = vmul.f32 0.5, %v2735_v12 }
 0x239   :  { %v561_v5 = vadd.f32 0.5, %v560_v3 }
 0x23a   :  { %v566_v16 = vadd.f32 0.5, %v565_v14 }
 0x23b   :  { %v568_v7 = vmul.f32 %v567_v6, %v561_v5 }
 0x23d   :  { %v569_v10 = vadd.f32 %v568_v7, %v3137_v62 }
 0x23f   :  { %2736 = vtanh.f32 %v569_v10 }
 0x249   :  { %v2737_v15 = vpop.eup %2736 }
 0x24a   :  { %v571_v19 = vsub.f32 %v415_v41, %v2737_v15 }
 0x24c   :  { %v572_v23 = vmul.f32 %v571_v19, %v566_v16 }
 0x24e   :  { %v573_v25 = vadd.f32 %v2737_v15, %v572_v23 }
 0x250   :  { %639 = vmatmul.mubr.f32.vlgmr.msra.gmra.mrb[10].mxu0 %v573_v25  ;;  %1992 = vmatmul.mubr.f32.vlgmr.msra.gmra.mrb[10].mxu1 %v573_v25 }
 0x251   :  { %2362 = vmatpush1.bf16.msra.mxu0 %v3040_v24  ;;  %2393 = vmatpush3.bf16.msra.mxu1 %v3044_v27 }
 0x252   :  { %2364 = vmatprep.subr.bf16.mxu0 %v3048_v30  ;;  %2394 = vmatprep.subr.bf16.mxu1 %v2876_v26 }
 0x253   :  { %796 = vmatprep.mubr.f32.mxu0 %v2875_v0  ;;  %2026 = vmatprep.mubr.msk.f32.mxu1 %vm2877_vm1, %v2875_v0 }
 0x255   :  { %2366 = vmatpush1.bf16.msra.mxu0 %v3050_v34  ;;  %2396 = vmatpush3.bf16.msra.mxu1 %v3054_v36 }
 0x256   :  { %2368 = vmatprep.subr.bf16.mxu0 %v3058_v39  ;;  %2397 = vmatprep.subr.bf16.mxu1 %v2876_v26 }
 0x259   :  { %2370 = vmatpush1.bf16.msra.mxu0 %v3060_v43  ;;  %2399 = vmatpush3.bf16.msra.mxu1 %v3064_v45 }
 0x25a   :  { %2372 = vmatprep.subr.bf16.mxu0 %v3068_v48  ;;  %2400 = vmatprep.subr.bf16.mxu1 %v2876_v26 }
 0x25d   :  { %2374 = vmatpush1.bf16.msra.mxu0 %v3070_v52  ;;  %2402 = vmatpush3.bf16.msra.mxu1 %v3074_v54 }
 0x25e   :  { %2376 = vmatprep.subr.bf16.mxu0 %v3078_v57  ;;  %2403 = vmatprep.subr.bf16.mxu1 %v2876_v26 }
 0x261   :  { %2378 = vmatpush1.bf16.msra.mxu0 %v3080_v61  ;;  %2405 = vmatpush3.bf16.msra.mxu1 %v3084_v63 }
 0x262   :  { %2380 = vmatprep.subr.bf16.mxu0 %v3088_v4  ;;  %2406 = vmatprep.subr.bf16.mxu1 %v2876_v26 }
 0x265   :  { %2382 = vmatpush1.bf16.msra.mxu0 %v3092_v8  ;;  %2408 = vmatpush3.bf16.msra.mxu1 %v3095_v9 }
 0x266   :  { %2384 = vmatprep.subr.bf16.mxu0 %v3098_v13  ;;  %2409 = vmatprep.subr.bf16.mxu1 %v2876_v26 }
 0x269   :  { %2386 = vmatpush1.bf16.msra.mxu0 %v3101_v17  ;;  %2411 = vmatpush3.bf16.msra.mxu1 %v3105_v21 }
 0x26a   :  { %2388 = vmatprep.subr.bf16.mxu0 %v3107_v22  ;;  %2412 = vmatprep.subr.bf16.mxu1 %v2876_v26 }
 0x26d   :  { %2390 = vmatpush1.bf16.msra.mxu0 %v3111_v31  ;;  %2414 = vmatpush3.bf16.msra.mxu1 %v3115_v32 }
 0x26e   :  { %2416 = vmatprep.subr.bf16.mxu0 %v3038_v20  ;;  %2447 = vmatprep.subr.bf16.mxu1 %v2876_v26 }
 0x323   :  { %v640_v62 = vpop.f32.mrb[10].mxu0  ;;  %v711_v28 = vpop.f32.mrb[10].mxu1 }
 0x324   :  { %v2697_v29 = vadd.f32 %v640_v62, %v3139_v2  ;;  %v642_v33 = vpop.f32.mrb[11].mxu0  ;;  %v1993_v35 = vpop.f32.mrb[11].mxu1  ;;  %v725_v50 = vadd.f32 %v3148_v18, %v711_v28 }
 0x325   :  { %v2698_v38 = vadd.f32 %v642_v33, %v3142_v11 }
 0x326   :  { %v716_v37 = vmul.f32 0.5, %v2697_v29 }
 0x327   :  { %v721_v41 = vmul.f32 0.5, %v2698_v38 }
 0x328   :  { %2738 = vtanh.f32 %v716_v37 }
 0x329   :  { %2740 = vtanh.f32 %v721_v41 }
 0x332   :  { %v2739_v40 = vpop.eup %2738 }
 0x333   :  { %v718_v44 = vmul.f32 0.5, %v2739_v40  ;;  %v2741_v59 = vpop.eup %2740 }
 0x334   :  { %v723_v60 = vmul.f32 0.5, %v2741_v59 }
 0x335   :  { %v719_v47 = vadd.f32 0.5, %v718_v44 }
 0x336   :  { %v724_v3 = vadd.f32 0.5, %v723_v60 }
 0x337   :  { %v726_v53 = vmul.f32 %v725_v50, %v719_v47 }
 0x339   :  { %v727_v56 = vadd.f32 %v726_v53, %v3133_v55 }
 0x33b   :  { %2742 = vtanh.f32 %v727_v56 }
 0x345   :  { %v2743_v1 = vpop.eup %2742 }
 0x346   :  { %v729_v5 = vsub.f32 %v573_v25, %v2743_v1 }
 0x348   :  { %v730_v6 = vmul.f32 %v729_v5, %v724_v3 }
 0x34a   :  { %v731_v7 = vadd.f32 %v2743_v1, %v730_v6 }
 0x34c   :  { %797 = vmatmul.mubr.f32.vlgmr.msra.gmra.mrb[8].mxu0 %v731_v7  ;;  %2027 = vmatmul.mubr.f32.vlgmr.msra.gmra.mrb[12].mxu1 %v731_v7 }
 0x34d   :  { %2418 = vmatpush1.bf16.msra.mxu0 %v3040_v24  ;;  %2449 = vmatpush3.bf16.msra.mxu1 %v3044_v27 }
 0x34e   :  { %2420 = vmatprep.subr.bf16.mxu0 %v3048_v30  ;;  %2450 = vmatprep.subr.bf16.mxu1 %v2876_v26 }
 0x34f   :  { %954 = vmatprep.mubr.f32.mxu0 %v2875_v0  ;;  %2061 = vmatprep.mubr.msk.f32.mxu1 %vm2877_vm1, %v2875_v0 }
 0x351   :  { %2422 = vmatpush1.bf16.msra.mxu0 %v3050_v34  ;;  %2452 = vmatpush3.bf16.msra.mxu1 %v3054_v36 }
 0x352   :  { %2424 = vmatprep.subr.bf16.mxu0 %v3058_v39  ;;  %2453 = vmatprep.subr.bf16.mxu1 %v2876_v26 }
 0x355   :  { %2426 = vmatpush1.bf16.msra.mxu0 %v3060_v43  ;;  %2455 = vmatpush3.bf16.msra.mxu1 %v3064_v45 }
 0x356   :  { %2428 = vmatprep.subr.bf16.mxu0 %v3068_v48  ;;  %2456 = vmatprep.subr.bf16.mxu1 %v2876_v26 }
 0x359   :  { %2430 = vmatpush1.bf16.msra.mxu0 %v3070_v52  ;;  %2458 = vmatpush3.bf16.msra.mxu1 %v3074_v54 }
 0x35a   :  { %2432 = vmatprep.subr.bf16.mxu0 %v3078_v57  ;;  %2459 = vmatprep.subr.bf16.mxu1 %v2876_v26 }
 0x35d   :  { %2434 = vmatpush1.bf16.msra.mxu0 %v3080_v61  ;;  %2461 = vmatpush3.bf16.msra.mxu1 %v3084_v63 }
 0x35e   :  { %2436 = vmatprep.subr.bf16.mxu0 %v3088_v4  ;;  %2462 = vmatprep.subr.bf16.mxu1 %v2876_v26 }
 0x361   :  { %2438 = vmatpush1.bf16.msra.mxu0 %v3092_v8  ;;  %2464 = vmatpush3.bf16.msra.mxu1 %v3095_v9 }
 0x362   :  { %2440 = vmatprep.subr.bf16.mxu0 %v3098_v13  ;;  %2465 = vmatprep.subr.bf16.mxu1 %v2876_v26 }
 0x365   :  { %2442 = vmatpush1.bf16.msra.mxu0 %v3101_v17  ;;  %2467 = vmatpush3.bf16.msra.mxu1 %v3105_v21 }
 0x366   :  { %2444 = vmatprep.subr.bf16.mxu0 %v3107_v22  ;;  %2468 = vmatprep.subr.bf16.mxu1 %v2876_v26 }
 0x369   :  { %2446 = vmatpush1.bf16.msra.mxu0 %v3111_v31  ;;  %2470 = vmatpush3.bf16.msra.mxu1 %v3115_v32 }
 0x36a   :  { %2472 = vmatprep.subr.bf16.mxu0 %v3038_v20  ;;  %2503 = vmatprep.subr.bf16.mxu1 %v2876_v26 }
 0x41f   :  { %v798_v55 = vpop.f32.mrb[8].mxu0  ;;  %v869_v10 = vpop.f32.mrb[12].mxu1 }
 0x420   :  { %v2695_v12 = vadd.f32 %v798_v55, %v3139_v2  ;;  %v800_v14 = vpop.f32.mrb[9].mxu0  ;;  %v2028_v15 = vpop.f32.mrb[13].mxu1  ;;  %v883_v29 = vadd.f32 %v3148_v18, %v869_v10 }
 0x421   :  { %v2696_v19 = vadd.f32 %v800_v14, %v3142_v11 }
 0x422   :  { %v874_v16 = vmul.f32 0.5, %v2695_v12 }
 0x423   :  { %v879_v23 = vmul.f32 0.5, %v2696_v19 }
 0x424   :  { %2744 = vtanh.f32 %v874_v16 }
 0x425   :  { %2746 = vtanh.f32 %v879_v23 }
 0x42e   :  { %v2745_v25 = vpop.eup %2744 }
 0x42f   :  { %v876_v62 = vmul.f32 0.5, %v2745_v25  ;;  %v2747_v37 = vpop.eup %2746 }
 0x430   :  { %v881_v38 = vmul.f32 0.5, %v2747_v37 }
 0x431   :  { %v877_v28 = vadd.f32 0.5, %v876_v62 }
 0x432   :  { %v882_v40 = vadd.f32 0.5, %v881_v38 }
 0x433   :  { %v884_v33 = vmul.f32 %v883_v29, %v877_v28 }
 0x435   :  { %v885_v35 = vadd.f32 %v884_v33, %v3135_v58 }
 0x437   :  { %2748 = vtanh.f32 %v885_v35 }
 0x441   :  { %v2749_v41 = vpop.eup %2748 }
 0x442   :  { %v887_v44 = vsub.f32 %v731_v7, %v2749_v41 }
 0x444   :  { %v888_v47 = vmul.f32 %v887_v44, %v882_v40 }
 0x446   :  { %v889_v50 = vadd.f32 %v2749_v41, %v888_v47 }
 0x448   :  { %955 = vmatmul.mubr.f32.vlgmr.msra.gmra.mrb[6].mxu0 %v889_v50  ;;  %2062 = vmatmul.mubr.f32.vlgmr.msra.gmra.mrb[14].mxu1 %v889_v50 }
 0x449   :  { %2474 = vmatpush1.bf16.msra.mxu0 %v3040_v24  ;;  %2505 = vmatpush3.bf16.msra.mxu1 %v3044_v27 }
 0x44a   :  { %2476 = vmatprep.subr.bf16.mxu0 %v3048_v30  ;;  %2506 = vmatprep.subr.bf16.mxu1 %v2876_v26 }
 0x44b   :  { %1112 = vmatprep.mubr.f32.mxu0 %v2875_v0  ;;  %2096 = vmatprep.mubr.msk.f32.mxu1 %vm2877_vm1, %v2875_v0 }
 0x44d   :  { %2478 = vmatpush1.bf16.msra.mxu0 %v3050_v34  ;;  %2508 = vmatpush3.bf16.msra.mxu1 %v3054_v36 }
 0x44e   :  { %2480 = vmatprep.subr.bf16.mxu0 %v3058_v39  ;;  %2509 = vmatprep.subr.bf16.mxu1 %v2876_v26 }
 0x451   :  { %2482 = vmatpush1.bf16.msra.mxu0 %v3060_v43  ;;  %2511 = vmatpush3.bf16.msra.mxu1 %v3064_v45 }
 0x452   :  { %2484 = vmatprep.subr.bf16.mxu0 %v3068_v48  ;;  %2512 = vmatprep.subr.bf16.mxu1 %v2876_v26 }
 0x455   :  { %2486 = vmatpush1.bf16.msra.mxu0 %v3070_v52  ;;  %2514 = vmatpush3.bf16.msra.mxu1 %v3074_v54 }
 0x456   :  { %2488 = vmatprep.subr.bf16.mxu0 %v3078_v57  ;;  %2515 = vmatprep.subr.bf16.mxu1 %v2876_v26 }
 0x459   :  { %2490 = vmatpush1.bf16.msra.mxu0 %v3080_v61  ;;  %2517 = vmatpush3.bf16.msra.mxu1 %v3084_v63 }
 0x45a   :  { %2492 = vmatprep.subr.bf16.mxu0 %v3088_v4  ;;  %2518 = vmatprep.subr.bf16.mxu1 %v2876_v26 }
 0x45d   :  { %2494 = vmatpush1.bf16.msra.mxu0 %v3092_v8  ;;  %2520 = vmatpush3.bf16.msra.mxu1 %v3095_v9 }
 0x45e   :  { %2496 = vmatprep.subr.bf16.mxu0 %v3098_v13  ;;  %2521 = vmatprep.subr.bf16.mxu1 %v2876_v26 }
 0x461   :  { %2498 = vmatpush1.bf16.msra.mxu0 %v3101_v17  ;;  %2523 = vmatpush3.bf16.msra.mxu1 %v3105_v21 }
 0x462   :  { %2500 = vmatprep.subr.bf16.mxu0 %v3107_v22  ;;  %2524 = vmatprep.subr.bf16.mxu1 %v2876_v26 }
 0x465   :  { %2502 = vmatpush1.bf16.msra.mxu0 %v3111_v31  ;;  %2526 = vmatpush3.bf16.msra.mxu1 %v3115_v32 }
 0x466   :  { %2528 = vmatprep.subr.bf16.mxu0 %v3038_v20  ;;  %2559 = vmatprep.subr.bf16.mxu1 %v2876_v26 }
 0x51b   :  { %v956_v58 = vpop.f32.mrb[6].mxu0  ;;  %v1027_v53 = vpop.f32.mrb[14].mxu1 }
 0x51c   :  { %v2693_v56 = vadd.f32 %v956_v58, %v3139_v2  ;;  %v958_v59 = vpop.f32.mrb[7].mxu0  ;;  %v2063_v60 = vpop.f32.mrb[15].mxu1  ;;  %v1041_v10 = vadd.f32 %v3148_v18, %v1027_v53 }
 0x51d   :  { %v2694_v3 = vadd.f32 %v958_v59, %v3142_v11 }
 0x51e   :  { %v1032_v1 = vmul.f32 0.5, %v2693_v56 }
 0x51f   :  { %v1037_v5 = vmul.f32 0.5, %v2694_v3 }
 0x520   :  { %2750 = vtanh.f32 %v1032_v1 }
 0x521   :  { %2752 = vtanh.f32 %v1037_v5 }
 0x52a   :  { %v2751_v6 = vpop.eup %2750 }
 0x52b   :  { %v1034_v7 = vmul.f32 0.5, %v2751_v6  ;;  %v2753_v15 = vpop.eup %2752 }
 0x52c   :  { %v1039_v16 = vmul.f32 0.5, %v2753_v15  ;;  %v1528_v15 = vld [vmem:[#allocation5 + $0x30] sm:$0xff] }
 0x52d   :  { %v1035_v55 = vadd.f32 0.5, %v1034_v7  ;;  %v1525_v7 = vld [vmem:[#allocation5 + $0x18] sm:$0xff] }
 0x52e   :  { %v1040_v23 = vadd.f32 0.5, %v1039_v16 }
 0x52f   :  { %v1042_v12 = vmul.f32 %v1041_v10, %v1035_v55  ;;  %v1526_v10 = vld [vmem:[#allocation5 + $0x20] sm:$0xff] }
 0x531   :  { %v1043_v14 = vadd.f32 %v1042_v12, %v3129_v49  ;;  %v1527_v12 = vld [vmem:[#allocation5 + $0x28] sm:$0xff] }
 0x533   :  { %2754 = vtanh.f32 %v1043_v14  ;;  %v2646_v14 = vpack.c.bf16 %v1527_v12, %v1526_v10  ;;  %v1631_v10 = vld [vmem:[#allocation7 + $0x78] sm:$0xff] }
 0x53d   :  { %v2755_v19 = vpop.eup %2754 }
 0x53e   :  { %v1045_v25 = vsub.f32 %v889_v50, %v2755_v19 }
 0x540   :  { %v1046_v62 = vmul.f32 %v1045_v25, %v1040_v23  ;;  %v1531_v23 = vld [vmem:[#allocation5 + $0x48] sm:$0xff] }
 0x542   :  { %v1047_v28 = vadd.f32 %v2755_v19, %v1046_v62  ;;  %v1530_v19 = vld [vmem:[#allocation5 + $0x40] sm:$0xff]  ;;  %v1532_v62 = vld [vmem:[#allocation5 + $0x50] sm:$0xff] }
 0x543   :  { %v2652_v25 = vpack.c.bf16 %v1531_v23, %v1530_v19 }
 0x544   :  { %1113 = vmatmul.mubr.f32.vlgmr.msra.gmra.mrb[4].mxu0 %v1047_v28  ;;  %2097 = vmatmul.mubr.f32.vlgmr.msra.gmra.mrb[16].mxu1 %v1047_v28 }
 0x545   :  { %2530 = vmatpush1.bf16.msra.mxu0 %v3040_v24  ;;  %2561 = vmatpush3.bf16.msra.mxu1 %v3044_v27 }
 0x546   :  { %2532 = vmatprep.subr.bf16.mxu0 %v3048_v30  ;;  %2562 = vmatprep.subr.bf16.mxu1 %v2876_v26 }
 0x547   :  { %1270 = vmatprep.mubr.f32.mxu0 %v2875_v0  ;;  %2131 = vmatprep.mubr.msk.f32.mxu1 %vm2877_vm1, %v2875_v0 }
 0x549   :  { %2534 = vmatpush1.bf16.msra.mxu0 %v3050_v34  ;;  %2564 = vmatpush3.bf16.msra.mxu1 %v3054_v36 }
 0x54a   :  { %2536 = vmatprep.subr.bf16.mxu0 %v3058_v39  ;;  %2565 = vmatprep.subr.bf16.mxu1 %v2876_v26 }
 0x54d   :  { %2538 = vmatpush1.bf16.msra.mxu0 %v3060_v43  ;;  %2567 = vmatpush3.bf16.msra.mxu1 %v3064_v45 }
 0x54e   :  { %2540 = vmatprep.subr.bf16.mxu0 %v3068_v48  ;;  %2568 = vmatprep.subr.bf16.mxu1 %v2876_v26 }
 0x551   :  { %2542 = vmatpush1.bf16.msra.mxu0 %v3070_v52  ;;  %2570 = vmatpush3.bf16.msra.mxu1 %v3074_v54 }
 0x552   :  { %2544 = vmatprep.subr.bf16.mxu0 %v3078_v57  ;;  %2571 = vmatprep.subr.bf16.mxu1 %v2876_v26 }
 0x555   :  { %2546 = vmatpush1.bf16.msra.mxu0 %v3080_v61  ;;  %2573 = vmatpush3.bf16.msra.mxu1 %v3084_v63 }
 0x556   :  { %2548 = vmatprep.subr.bf16.mxu0 %v3088_v4  ;;  %2574 = vmatprep.subr.bf16.mxu1 %v2876_v26 }
 0x559   :  { %2550 = vmatpush1.bf16.msra.mxu0 %v3092_v8  ;;  %2576 = vmatpush3.bf16.msra.mxu1 %v3095_v9 }
 0x55a   :  { %2552 = vmatprep.subr.bf16.mxu0 %v3098_v13  ;;  %2577 = vmatprep.subr.bf16.mxu1 %v2876_v26 }
 0x55d   :  { %2554 = vmatpush1.bf16.msra.mxu0 %v3101_v17  ;;  %2579 = vmatpush3.bf16.msra.mxu1 %v3105_v21 }
 0x55e   :  { %2556 = vmatprep.subr.bf16.mxu0 %v3107_v22  ;;  %2580 = vmatprep.subr.bf16.mxu1 %v2876_v26 }
 0x561   :  { %2558 = vmatpush1.bf16.msra.mxu0 %v3111_v31  ;;  %2582 = vmatpush3.bf16.msra.mxu1 %v3115_v32 }
 0x562   :  { %2584 = vmatprep.subr.bf16.mxu0 %v3038_v20  ;;  %2615 = vmatprep.subr.bf16.mxu1 %v2876_v26 }
 0x617   :  { %v1114_v49 = vpop.f32.mrb[4].mxu0  ;;  %v1185_v29 = vpop.f32.mrb[16].mxu1 }
 0x618   :  { %v2691_v33 = vadd.f32 %v1114_v49, %v3139_v2  ;;  %v1116_v35 = vpop.f32.mrb[5].mxu0  ;;  %v2098_v37 = vpop.f32.mrb[17].mxu1  ;;  %v1199_v58 = vadd.f32 %v3148_v18, %v1185_v29  ;;  %v1534_v29 = vld [vmem:[#allocation5 + $0x60] sm:$0xff] }
 0x619   :  { %v2692_v41 = vadd.f32 %v1116_v35, %v3142_v11  ;;  %v1536_v37 = vld [vmem:[#allocation5 + $0x70] sm:$0xff] }
 0x61a   :  { %v1190_v38 = vmul.f32 0.5, %v2691_v33  ;;  %v1535_v33 = vld [vmem:[#allocation5 + $0x68] sm:$0xff] }
 0x61b   :  { %v1195_v40 = vmul.f32 0.5, %v2692_v41  ;;  %v2658_v35 = vpack.c.bf16 %v1535_v33, %v1534_v29 }
 0x61c   :  { %2756 = vtanh.f32 %v1190_v38  ;;  %v1537_v38 = vld [vmem:[#allocation5 + $0x78] sm:$0xff] }
 0x61d   :  { %2758 = vtanh.f32 %v1195_v40  ;;  %v2661_v41 = vpack.c.bf16 %v1537_v38, %v1536_v37  ;;  %v1616_v40 = vld [vmem:[#allocation7] sm:$0xff] }
 0x626   :  { %v2757_v44 = vpop.eup %2756 }
 0x627   :  { %v1192_v47 = vmul.f32 0.5, %v2757_v44  ;;  %v2759_v56 = vpop.eup %2758  ;;  %v1617_v44 = vld [vmem:[#allocation7 + $0x8] sm:$0xff] }
 0x628   :  { %v1197_v59 = vmul.f32 0.5, %v2759_v56  ;;  %v1621_v56 = vld [vmem:[#allocation7 + $0x28] sm:$0xff] }
 0x629   :  { %v1193_v50 = vadd.f32 0.5, %v1192_v47  ;;  %v1618_v47 = vld [vmem:[#allocation7 + $0x10] sm:$0xff] }
 0x62a   :  { %v1198_v1 = vadd.f32 0.5, %v1197_v59 }
 0x62b   :  { %v1200_v20 = vmul.f32 %v1199_v58, %v1193_v50  ;;  %v2664_v50 = vpack.c.bf16 %v1617_v44, %v1616_v40  ;;  %v1619_v58 = vld [vmem:[#allocation7 + $0x18] sm:$0xff] }
 0x62d   :  { %v1201_v53 = vadd.f32 %v1200_v20, %v3131_v51  ;;  %v1524_v51 = vld [vmem:[#allocation5 + $0x10] sm:$0xff]  ;;  %v2667_v20 = vpack.c.bf16 %v1619_v58, %v1618_v47 }
 0x62e   :  { %v2643_v55 = vpack.c.bf16 %v1525_v7, %v1524_v51 }
 0x62f   :  { %2760 = vtanh.f32 %v1201_v53  ;;  %v1620_v53 = vld [vmem:[#allocation7 + $0x20] sm:$0xff] }
 0x630   :  { %v2670_v59 = vpack.c.bf16 %v1621_v56, %v1620_v53 }
 0x639   :  { %v2761_v60 = vpop.eup %2760 }
 0x63a   :  { %v1203_v3 = vsub.f32 %v1047_v28, %v2761_v60  ;;  %v1533_v28 = vld [vmem:[#allocation5 + $0x58] sm:$0xff] }
 0x63b   :  { %v2655_v49 = vpack.c.bf16 %v1533_v28, %v1532_v62 }
 0x63c   :  { %v1204_v5 = vmul.f32 %v1203_v3, %v1198_v1  ;;  %v1623_v1 = vld [vmem:[#allocation7 + $0x38] sm:$0xff] }
 0x63e   :  { %v1205_v6 = vadd.f32 %v2761_v60, %v1204_v5  ;;  %v1622_v60 = vld [vmem:[#allocation7 + $0x30] sm:$0xff]  ;;  %v1624_v5 = vld [vmem:[#allocation7 + $0x40] sm:$0xff] }
 0x63f   :  { %v2673_v3 = vpack.c.bf16 %v1623_v1, %v1622_v60 }
 0x640   :  { %1271 = vmatmul.mubr.f32.vlgmr.msra.gmra.mrb[2].mxu0 %v1205_v6  ;;  %2132 = vmatmul.mubr.f32.vlgmr.msra.gmra.mrb[18].mxu1 %v1205_v6 }
 0x641   :  { %2586 = vmatpush1.bf16.msra.mxu0 %v3040_v24  ;;  %2617 = vmatpush3.bf16.msra.mxu1 %v3044_v27 }
 0x642   :  { %2588 = vmatprep.subr.bf16.mxu0 %v3048_v30  ;;  %2618 = vmatprep.subr.bf16.mxu1 %v2876_v26 }
 0x643   :  { %1428 = vmatprep.mubr.f32.mxu0 %v2875_v0  ;;  %2166 = vmatprep.mubr.msk.f32.mxu1 %vm2877_vm1, %v2875_v0 }
 0x645   :  { %2590 = vmatpush1.bf16.msra.mxu0 %v3050_v34  ;;  %2620 = vmatpush3.bf16.msra.mxu1 %v3054_v36 }
 0x646   :  { %2592 = vmatprep.subr.bf16.mxu0 %v3058_v39  ;;  %2621 = vmatprep.subr.bf16.mxu1 %v2876_v26 }
 0x649   :  { %2594 = vmatpush1.bf16.msra.mxu0 %v3060_v43  ;;  %2623 = vmatpush3.bf16.msra.mxu1 %v3064_v45 }
 0x64a   :  { %2596 = vmatprep.subr.bf16.mxu0 %v3068_v48  ;;  %2624 = vmatprep.subr.bf16.mxu1 %v2876_v26 }
 0x64d   :  { %2598 = vmatpush1.bf16.msra.mxu0 %v3070_v52  ;;  %2626 = vmatpush3.bf16.msra.mxu1 %v3074_v54 }
 0x64e   :  { %2600 = vmatprep.subr.bf16.mxu0 %v3078_v57  ;;  %2627 = vmatprep.subr.bf16.mxu1 %v2876_v26 }
 0x651   :  { %2602 = vmatpush1.bf16.msra.mxu0 %v3080_v61  ;;  %2629 = vmatpush3.bf16.msra.mxu1 %v3084_v63 }
 0x652   :  { %2604 = vmatprep.subr.bf16.mxu0 %v3088_v4  ;;  %2630 = vmatprep.subr.bf16.mxu1 %v2876_v26 }
 0x655   :  { %2606 = vmatpush1.bf16.msra.mxu0 %v3092_v8  ;;  %2632 = vmatpush3.bf16.msra.mxu1 %v3095_v9 }
 0x656   :  { %2608 = vmatprep.subr.bf16.mxu0 %v3098_v13  ;;  %2633 = vmatprep.subr.bf16.mxu1 %v2876_v26 }
 0x659   :  { %2610 = vmatpush1.bf16.msra.mxu0 %v3101_v17  ;;  %2635 = vmatpush3.bf16.msra.mxu1 %v3105_v21 }
 0x65a   :  { %2612 = vmatprep.subr.bf16.mxu0 %v3107_v22  ;;  %2636 = vmatprep.subr.bf16.mxu1 %v2876_v26 }
 0x65d   :  { %2614 = vmatpush1.bf16.msra.mxu0 %v3111_v31  ;;  %2638 = vmatpush3.bf16.msra.mxu1 %v3115_v32  ;;  %v1522_v31 = vld [vmem:[#allocation5] sm:$0xff]  ;;  %v1523_v32 = vld [vmem:[#allocation5 + $0x8] sm:$0xff] }
 0x65e   :  { %2639 = vmatprep.subr.bf16.mxu0 %v2876_v26  ;;  %2663 = vmatprep.subr.bf16.mxu1 %v2876_v26 }
 0x713   :  { %v1272_v24 = vpop.f32.mrb[2].mxu0  ;;  %v1343_v27 = vpop.f32.mrb[18].mxu1 }
 0x714   :  { %v2689_v30 = vadd.f32 %v1272_v24, %v3139_v2  ;;  %v1274_v34 = vpop.f32.mrb[3].mxu0  ;;  %v2133_v36 = vpop.f32.mrb[19].mxu1  ;;  %v1357_v57 = vadd.f32 %v3148_v18, %v1343_v27  ;;  %v1626_v27 = vld [vmem:[#allocation7 + $0x50] sm:$0xff] }
 0x715   :  { %v2690_v43 = vadd.f32 %v1274_v34, %v3142_v11  ;;  %v1628_v36 = vld [vmem:[#allocation7 + $0x60] sm:$0xff] }
 0x716   :  { %v1348_v39 = vmul.f32 0.5, %v2689_v30  ;;  %v1627_v30 = vld [vmem:[#allocation7 + $0x58] sm:$0xff] }
 0x717   :  { %v1353_v45 = vmul.f32 0.5, %v2690_v43  ;;  %v2679_v34 = vpack.c.bf16 %v1627_v30, %v1626_v27 }
 0x718   :  { %2762 = vtanh.f32 %v1348_v39  ;;  %v1629_v39 = vld [vmem:[#allocation7 + $0x68] sm:$0xff] }
 0x719   :  { %2764 = vtanh.f32 %v1353_v45  ;;  %v2682_v43 = vpack.c.bf16 %v1629_v39, %v1628_v36 }
 0x722   :  { %v2763_v48 = vpop.eup %2762 }
 0x723   :  { %v1350_v52 = vmul.f32 0.5, %v2763_v48  ;;  %v2765_v4 = vpop.eup %2764 }
 0x724   :  { %v1355_v8 = vmul.f32 0.5, %v2765_v4 }
 0x725   :  { %v1351_v54 = vadd.f32 0.5, %v1350_v52 }
 0x726   :  { %v1356_v13 = vadd.f32 0.5, %v1355_v8 }
 0x727   :  { %v1358_v61 = vmul.f32 %v1357_v57, %v1351_v54 }
 0x729   :  { %v1359_v63 = vadd.f32 %v1358_v61, %v3125_v42  ;;  %v2640_v42 = vpack.c.bf16 %v1523_v32, %v1522_v31 }
 0x72b   :  { %2766 = vtanh.f32 %v1359_v63 }
 0x735   :  { %v2767_v9 = vpop.eup %2766 }
 0x736   :  { %v1361_v17 = vsub.f32 %v1205_v6, %v2767_v9  ;;  %v1625_v6 = vld [vmem:[#allocation7 + $0x48] sm:$0xff] }
 0x737   :  { %v2676_v24 = vpack.c.bf16 %v1625_v6, %v1624_v5 }
 0x738   :  { %v1362_v21 = vmul.f32 %v1361_v17, %v1356_v13 }
 0x73a   :  { %v3385_v22 = vadd.f32 %v2767_v9, %v1362_v21 }
 0x73c   :  { %1429 = vmatmul.mubr.f32.vlgmr.msra.gmra.mrb[0].mxu0 %v3385_v22  ;;  %2167 = vmatmul.mubr.f32.vlgmr.msra.gmra.mrb[20].mxu1 %v3385_v22 }
 0x73d   :  { %2201 = vmatprep.mubr.msk.f32.mxu0 %vm2877_vm1, %v2875_v0  ;;  %2236 = vmatprep.mubr.msk.f32.mxu1 %vm2877_vm1, %v2875_v0  ;;  %v1529_v0 = vld [vmem:[#allocation5 + $0x38] sm:$0xff] }
 0x73e   :  { %2641 = vmatpush3.bf16.msra.mxu0 %v2640_v42  ;;  %v2649_v16 = vpack.c.bf16 %v1529_v0, %v1528_v15  ;;  %2665 = vmatpush3.bf16.msra.mxu1 %v2664_v50 }
 0x73f   :  { %2642 = vmatprep.subr.bf16.mxu0 %v2876_v26  ;;  %2666 = vmatprep.subr.bf16.mxu1 %v2876_v26 }
 0x742   :  { %2644 = vmatpush3.bf16.msra.mxu0 %v2643_v55  ;;  %2668 = vmatpush3.bf16.msra.mxu1 %v2667_v20 }
 0x743   :  { %2645 = vmatprep.subr.bf16.mxu0 %v2876_v26  ;;  %2669 = vmatprep.subr.bf16.mxu1 %v2876_v26 }
 0x746   :  { %2647 = vmatpush3.bf16.msra.mxu0 %v2646_v14  ;;  %2671 = vmatpush3.bf16.msra.mxu1 %v2670_v59 }
 0x747   :  { %2648 = vmatprep.subr.bf16.mxu0 %v2876_v26  ;;  %2672 = vmatprep.subr.bf16.mxu1 %v2876_v26 }
 0x74a   :  { %2650 = vmatpush3.bf16.msra.mxu0 %v2649_v16  ;;  %2674 = vmatpush3.bf16.msra.mxu1 %v2673_v3 }
 0x74b   :  { %2651 = vmatprep.subr.bf16.mxu0 %v2876_v26  ;;  %2675 = vmatprep.subr.bf16.mxu1 %v2876_v26 }
 0x74e   :  { %2653 = vmatpush3.bf16.msra.mxu0 %v2652_v25  ;;  %2677 = vmatpush3.bf16.msra.mxu1 %v2676_v24 }
 0x74f   :  { %2654 = vmatprep.subr.bf16.mxu0 %v2876_v26  ;;  %2678 = vmatprep.subr.bf16.mxu1 %v2876_v26 }
 0x752   :  { %2656 = vmatpush3.bf16.msra.mxu0 %v2655_v49  ;;  %2680 = vmatpush3.bf16.msra.mxu1 %v2679_v34 }
 0x753   :  { %2657 = vmatprep.subr.bf16.mxu0 %v2876_v26  ;;  %2681 = vmatprep.subr.bf16.mxu1 %v2876_v26 }
 0x756   :  { %2659 = vmatpush3.bf16.msra.mxu0 %v2658_v35  ;;  %2683 = vmatpush3.bf16.msra.mxu1 %v2682_v43 }
 0x757   :  { %2660 = vmatprep.subr.bf16.mxu0 %v2876_v26  ;;  %2684 = vmatprep.subr.bf16.mxu1 %v2876_v26 }
 0x75a   :  { %2662 = vmatpush3.bf16.msra.mxu0 %v2661_v41 }
 0x80f   :  { %v1430_v45 = vpop.f32.mrb[0].mxu0  ;;  %v1501_v48 = vpop.f32.mrb[20].mxu1 }
 0x810   :  { %v2687_v52 = vadd.f32 %v1430_v45, %v3139_v2  ;;  %v1432_v54 = vpop.f32.mrb[1].mxu0  ;;  %v2168_v57 = vpop.f32.mrb[21].mxu1  ;;  %v1515_v17 = vadd.f32 %v3148_v18, %v1501_v48  ;;  %v1743_v18 = vld [vmem:[%s3436_s6] ss:$0 sm:$0xff] }
 0x811   :  { %v2688_v63 = vadd.f32 %v1432_v54, %v3142_v11  ;;  %v1630_v11 = vld [vmem:[#allocation7 + $0x70] sm:$0xff] }
 0x812   :  { %v1506_v61 = vmul.f32 0.5, %v2687_v52  ;;  %v2685_v12 = vpack.c.bf16 %v1631_v10, %v1630_v11 }
 0x813   :  { %v1511_v4 = vmul.f32 0.5, %v2688_v63 }
 0x814   :  { %2768 = vtanh.f32 %v1506_v61  ;;  %2686 = vmatpush3.bf16.msra.mxu1 %v2685_v12 }
 0x815   :  { %2770 = vtanh.f32 %v1511_v4 }
 0x81e   :  { %v2769_v8 = vpop.eup %2768 }
 0x81f   :  { %v1508_v9 = vmul.f32 0.5, %v2769_v8  ;;  %v2771_v31 = vpop.eup %2770 }
 0x820   :  { %v1513_v32 = vmul.f32 0.5, %v2771_v31 }
 0x821   :  { %v1509_v13 = vadd.f32 0.5, %v1508_v9 }
 0x822   :  { %v1514_v42 = vadd.f32 0.5, %v1513_v32 }
 0x823   :  { %v1516_v21 = vmul.f32 %v1515_v17, %v1509_v13 }
 0x825   :  { %v1517_v26 = vadd.f32 %v1516_v21, %v3127_v46 }
 0x827   :  { %2772 = vtanh.f32 %v1517_v26 }
 0x831   :  { %v2773_v2 = vpop.eup %2772 }
 0x832   :  { %v1519_v51 = vsub.f32 %v3385_v22, %v2773_v2  ;;  %v1744_v22 = vld [vmem:[%s3438_s8] ss:$0 sm:$0xff] }
 0x834   :  { %v1520_v7 = vmul.f32 %v1519_v51, %v1514_v42 }
 0x836   :  { %v1521_v55 = vadd.f32 %v2773_v2, %v1520_v7 }
 0x838   :  { %2202 = vmatmul.mubr.f32.vlgmr.msra.gmra.mrb[16].mxu0 %v1521_v55 }
 0x90b   :  { %v1611_v14 = vpop.f32.mrb[16].mxu0 }
 0x90c   :  { %v1612_v46 = vadd.f32 %v1743_v18, %v1611_v14  ;;  %v2203_v15 = vpop.f32.mrb[17].mxu0 }
 0x90e   :  { %v1615_v0 = vmax.f32 %v1612_v46, 0.0 }
 0x910   :  { %2237 = vmatmul.mubr.f32.vlgmr.msra.gmra.mrb[22].mxu1 %v1615_v0 }
 0x9e3   :  { %v1705_v16 = vpop.f32.mrb[22].mxu1 }
 0x9e4   :  { %v1706_v19 = vadd.f32 %v1744_v22, %v1705_v16  ;;  %v2238_v23 = vpop.f32.mrb[23].mxu1 }
 0x9e6   :  { %1709 = vst [vmem:[#allocation8] sm:$0xff] %v1706_v19 }
 0x9e7   :  { %2851 = shalt.err (!%p2848_p0)
}
 0x9e8   :  { %s2852_s15 = scalar_lea.hbm %s3439_s9, 128 }
 0x9e9   :  { %p2853_p1 = scmp.ne.s32.totalorder %s3439_s9, %s2852_s15  ;;  %p2856_p2 = scmp.lt.u32.totalorder %s2852_s15, %s3439_s9 }
 0x9eb   :  { %p2858_p3 = pnand %p2856_p2, %p2853_p1 }
 0x9ed   :  { %2861 = shalt.err (!%p2858_p3)
}
 0x9ee   :  { %1719 = dma.vmem_to_hbm [thread:$0]  %s1717_s10, 128, %s3439_s9, [#allocation4]  }
 0x9ef   :  { %2866 = dma.done.wait [#allocation4], 128  }
 0x9f0   :  { %2867 = vsyncadd [#allocation4], 4294967168 }
 0x9f1   :  { %1723 = vsyncpa [#allocation3], 1 }
 0x9f2   :  { %1724 = vsyncpa [#allocation6], 1 }
 0x9f3   :  { %1725 = vsyncpa [#allocation4], 1 }

</bundles_post_ra>
